<compile_context>
chip_gen: v7x
topology: tpu7x:2x2x1
jax: 0.10.0
libtpu: 0.0.40
codegen_flags: <defaults>
</compile_context>

<pallas_src>
import functools

import jax
import jax.numpy as jnp
from jax import lax
from jax.experimental import pallas as pl
from jax.experimental.pallas import tpu as pltpu

EPS = 1e-5          # nn.LayerNorm default
_NEG_INF = -1e30    # finite "minus infinity" for masked softmax logits


def _round_up(x, m):
    return ((x + m - 1) // m) * m


def _ln(x, w, b):
    """LayerNorm over last axis, computed in float32 (fp16-safe LayerNorm)."""
    xf = x.astype(jnp.float32)
    mu = jnp.mean(xf, axis=-1, keepdims=True)
    var = jnp.mean(jnp.square(xf - mu), axis=-1, keepdims=True)
    y = (xf - mu) * lax.rsqrt(var + EPS)
    return y * w + b


def _clamp_vmem(est_bytes):
    """Explicit scoped-VMEM limit: 2x headroom, clamped to a portable range."""
    return int(min(max(2 * est_bytes, 32 << 20), 64 << 20))


def _largest_divisor_leq(n, cap):
    for d in range(max(1, min(n, cap)), 0, -1):
        if n % d == 0:
            return d
    return 1


def _pick_bt(batch, per_elem_bytes, budget=24 << 20):
    """Largest batch tile that fits the activation budget, keeping >=2 grid steps."""
    cap = max(1, budget // max(per_elem_bytes, 1))
    bt = _largest_divisor_leq(batch, cap)
    if bt == batch and batch > 1:
        bt = _largest_divisor_leq(batch, batch // 2)
    return bt


# ----------------------------- Pallas kernels ------------------------------


def _embed_pre_kernel(p_ref, w_ref, cls_ref, pos_ref, gw_ref, gb_ref, o_ref,
                      *, seq_len):
    """Fused patch-embed matmul + class token + positional embedding + ln_pre."""
    Np = p_ref.shape[1]
    D = w_ref.shape[1]
    Lp = o_ref.shape[1]

    # (Np, Cpp) @ (Cpp, D) in bf16 on the MXU, f32 accumulation.
    emb = jnp.dot(p_ref[0], w_ref[...], preferred_element_type=jnp.float32)

    cls_row = _ln(cls_ref[...] + pos_ref[0:1, :], gw_ref[...], gb_ref[...])   # (1, D)
    body = _ln(emb + pos_ref[1:1 + Np, :], gw_ref[...], gb_ref[...])          # (Np, D)

    o_ref[0:1, 0:1, :] = cls_row[None].astype(o_ref.dtype)
    o_ref[0:1, 1:1 + Np, :] = body[None].astype(o_ref.dtype)
    if Lp > seq_len:
        # Padded rows must hold finite values (they are masked as keys later).
        o_ref[0:1, seq_len:Lp, :] = jnp.zeros((1, Lp - seq_len, D), o_ref.dtype)


def _block_kernel(x_ref, ln1w, ln1b, wqkv, bqkv, wo, bo, ln2w, ln2b,
                  wfc, bfc, wpr, bpr, o_ref, attn_scr, *, num_heads, seq_len):
    """One ResidualAttentionBlock over Bt batch elements, fused in VMEM."""
    Bt, Lp, D = x_ref.shape
    hd = D // num_heads
    scale = 1.0 / (hd ** 0.5)
    bf16 = jnp.bfloat16

    x = x_ref[...].astype(jnp.float32).reshape(Bt * Lp, D)

    # ---- multi-head self-attention (no mask, dropout=0) ----
    h = _ln(x, ln1w[...], ln1b[...]).astype(bf16)
    qkv = jnp.dot(h, wqkv[...], preferred_element_type=jnp.float32) + bqkv[...]
    q = (qkv[:, 0 * D:1 * D] * scale).reshape(Bt, Lp, D)
    k = qkv[:, 1 * D:2 * D].reshape(Bt, Lp, D)
    v = qkv[:, 2 * D:3 * D].reshape(Bt, Lp, D)

    if Lp > seq_len:
        kmask = lax.broadcasted_iota(jnp.int32, (1, 1, Lp), 2) < seq_len
    else:
        kmask = None

    # Static loop over heads; each head is a Bt-batched contraction on the MXU.
    # Head outputs go straight into a VMEM scratch (no concatenate).
    for hh in range(num_heads):
        c0, c1 = hh * hd, (hh + 1) * hd
        qh = q[:, :, c0:c1].astype(bf16)
        kh = k[:, :, c0:c1].astype(bf16)
        vh = v[:, :, c0:c1].astype(bf16)
        s = jnp.einsum("bqd,bkd->bqk", qh, kh,
                       preferred_element_type=jnp.float32)          # (Bt, Lp, Lp)
        if kmask is not None:
            s = jnp.where(kmask, s, _NEG_INF)
        s = s - jnp.max(s, axis=-1, keepdims=True)
        p = jnp.exp(s)
        p = p * pl.reciprocal(jnp.sum(p, axis=-1, keepdims=True), approx=True)
        oh = jnp.einsum("bqk,bkd->bqd", p.astype(bf16), vh,
                        preferred_element_type=jnp.float32)          # (Bt, Lp, hd)
        attn_scr[:, :, c0:c1] = oh

    attn = attn_scr[...].reshape(Bt * Lp, D).astype(bf16)
    x = x + jnp.dot(attn, wo[...], preferred_element_type=jnp.float32) + bo[...]

    # ---- MLP: Linear -> QuickGELU -> Linear ----
    h2 = _ln(x, ln2w[...], ln2b[...]).astype(bf16)
    m = jnp.dot(h2, wfc[...], preferred_element_type=jnp.float32) + bfc[...]
    m = m * jax.nn.sigmoid(1.702 * m)  # QuickGELU (f32, VPU/EUP)
    m = jnp.dot(m.astype(bf16), wpr[...], preferred_element_type=jnp.float32) + bpr[...]
    x = x + m

    o_ref[...] = x.reshape(Bt, Lp, D).astype(o_ref.dtype)


def _post_kernel(x_ref, w_ref, b_ref, p_ref, o_ref):
    h = _ln(x_ref[...], w_ref[...], b_ref[...]).astype(jnp.bfloat16)
    o_ref[...] = jnp.dot(
        h, p_ref[...], preferred_element_type=jnp.float32
    ).astype(o_ref.dtype)


# ------------------------------- forward -----------------------------------


def vit_forward(x, params, *, patch_size, num_heads):
    f32, bf16 = jnp.float32, jnp.bfloat16
    B, C, H, W = x.shape
    p = patch_size
    gh, gw = H // p, W // p
    Np = gh * gw
    Cpp = C * p * p
    D = params["conv_w"].shape[1]
    L = Np + 1
    Lp = _round_up(L, 8)  # sublane-dense sequence length (pad masked in softmax)

    # Layout glue: NCHW conv(kernel=stride=patch) == patch-row matmul.
    patches = (
        x.reshape(B, C, gh, p, gw, p)
        .transpose(0, 2, 4, 1, 3, 5)
        .reshape(B, Np, Cpp)
    ).astype(bf16)

    conv_w = params["conv_w"].astype(bf16)

    # ---- fused patch-embed + cls + pos_emb + ln_pre (grid over batch) ----
    pre_est = Np * Cpp * 2 * 2 + Cpp * D * 2 * 2 + 2 * Lp * D * 4 * 2
    tokens = pl.pallas_call(
        functools.partial(_embed_pre_kernel, seq_len=L),
        out_shape=jax.ShapeDtypeStruct((B, Lp, D), f32),
        grid=(B,),
        in_specs=[
            pl.BlockSpec((1, Np, Cpp), lambda b: (b, 0, 0)),
            pl.BlockSpec((Cpp, D), lambda b: (0, 0)),
            pl.BlockSpec((1, D), lambda b: (0, 0)),
            pl.BlockSpec((L, D), lambda b: (0, 0)),
            pl.BlockSpec((1, D), lambda b: (0, 0)),
            pl.BlockSpec((1, D), lambda b: (0, 0)),
        ],
        out_specs=pl.BlockSpec((1, Lp, D), lambda b: (b, 0, 0)),
        compiler_params=pltpu.CompilerParams(
            dimension_semantics=("parallel",),
            vmem_limit_bytes=_clamp_vmem(pre_est),
        ),
    )(patches, conv_w, params["class_emb"].reshape(1, D).astype(f32),
      params["pos_emb"].astype(f32), params["ln_pre_w"], params["ln_pre_b"])

    # ---- transformer blocks: Bt batch elements per grid step ----
    act_per_elem = (
        2 * Lp * D * 4 * 2          # x in/out blocks, double-buffered
        + Lp * 3 * D * 4            # qkv
        + Lp * D * 4                # attention scratch
        + Lp * 4 * D * 4            # MLP hidden
        + 3 * Lp * Lp * 4           # per-head scores / probs (transient)
    )
    Bt = _pick_bt(B, act_per_elem)
    grid_blk = B // Bt
    w_bytes = 12 * D * D * 2 * 2 + 16 * D * 4 * 2   # bf16 weights (dbl-buf) + f32 biases/LN
    vmem_blk = _clamp_vmem(w_bytes + Bt * act_per_elem)

    for blk in params["blocks"]:
        weight_args = (
            blk["ln1_w"], blk["ln1_b"],
            blk["w_qkv"].astype(bf16), blk["b_qkv"],
            blk["w_out"].astype(bf16), blk["b_out"],
            blk["ln2_w"], blk["ln2_b"],
            blk["w_fc"].astype(bf16), blk["b_fc"],
            blk["w_proj"].astype(bf16), blk["b_proj"],
        )
        w_specs = [pl.BlockSpec(w.shape, lambda b: (0, 0)) for w in weight_args]
        tokens = pl.pallas_call(
            functools.partial(_block_kernel, num_heads=num_heads, seq_len=L),
            out_shape=jax.ShapeDtypeStruct((B, Lp, D), f32),
            grid=(grid_blk,),
            in_specs=[pl.BlockSpec((Bt, Lp, D), lambda b: (b, 0, 0))] + w_specs,
            out_specs=pl.BlockSpec((Bt, Lp, D), lambda b: (b, 0, 0)),
            scratch_shapes=[pltpu.VMEM((Bt, Lp, D), jnp.float32)],
            compiler_params=pltpu.CompilerParams(
                dimension_semantics=("parallel",),
                vmem_limit_bytes=vmem_blk,
            ),
        )(tokens, *weight_args)

    # ---- ln_post on the class token, then final projection ----
    cls_tok = tokens[:, 0, :]  # (B, D)
    out_dim = params["proj"].shape[1]
    post_est = B * D * 4 * 2 + D * out_dim * 2 * 2 + B * out_dim * 4 * 2
    out = pl.pallas_call(
        _post_kernel,
        out_shape=jax.ShapeDtypeStruct((B, out_dim), f32),
        grid=(1,),
        in_specs=[
            pl.BlockSpec((B, D), lambda i: (0, 0)),
            pl.BlockSpec((1, D), lambda i: (0, 0)),
            pl.BlockSpec((1, D), lambda i: (0, 0)),
            pl.BlockSpec((D, out_dim), lambda i: (0, 0)),
        ],
        out_specs=pl.BlockSpec((B, out_dim), lambda i: (0, 0)),
        compiler_params=pltpu.CompilerParams(
            dimension_semantics=("arbitrary",),
            vmem_limit_bytes=_clamp_vmem(post_est),
        ),
    )(cls_tok, params["ln_post_w"], params["ln_post_b"], params["proj"].astype(bf16))
    return out


# ----------------------------- params / reference ---------------------------


def init_params(key, *, input_resolution, patch_size, width, layers, heads, output_dim):
    C = 3
    scale = width ** -0.5
    Np = (input_resolution // patch_size) ** 2
    L = Np + 1
    ks = jax.random.split(key, 4 + layers)

    conv_w = jax.random.normal(ks[0], (width, C, patch_size, patch_size), jnp.float32) * 0.02
    conv_w_flat = conv_w.reshape(width, -1).T  # (C*p*p, width) for x @ W

    class_emb = scale * jax.random.normal(ks[1], (width,), jnp.float32)
    pos_emb = scale * jax.random.normal(ks[2], (L, width), jnp.float32)
    proj = scale * jax.random.normal(ks[3], (width, output_dim), jnp.float32)

    blocks = []
    for i in range(layers):
        bk = jax.random.split(ks[4 + i], 8)
        w_qkv = jax.random.normal(bk[0], (3 * width, width), jnp.float32) * (width ** -0.5)
        b_qkv = jax.random.normal(bk[1], (1, 3 * width), jnp.float32) * 0.02
        w_out = jax.random.normal(bk[2], (width, width), jnp.float32) * (width ** -0.5)
        b_out = jax.random.normal(bk[3], (1, width), jnp.float32) * 0.02
        w_fc = jax.random.normal(bk[4], (4 * width, width), jnp.float32) * ((2 * width) ** -0.5)
        b_fc = jax.random.normal(bk[5], (1, 4 * width), jnp.float32) * 0.02
        w_proj = jax.random.normal(bk[6], (width, 4 * width), jnp.float32) * (width ** -0.5)
        b_proj = jax.random.normal(bk[7], (1, width), jnp.float32) * 0.02
        blocks.append(dict(
            ln1_w=jnp.ones((1, width), jnp.float32),
            ln1_b=jnp.zeros((1, width), jnp.float32),
            w_qkv=w_qkv.T, b_qkv=b_qkv,        # stored (D, 3D): kernel does x @ W
            w_out=w_out.T, b_out=b_out,
            ln2_w=jnp.ones((1, width), jnp.float32),
            ln2_b=jnp.zeros((1, width), jnp.float32),
            w_fc=w_fc.T, b_fc=b_fc,
            w_proj=w_proj.T, b_proj=b_proj,
        ))

    return dict(
        conv_w=conv_w_flat,
        class_emb=class_emb,
        pos_emb=pos_emb,
        ln_pre_w=jnp.ones((1, width), jnp.float32),
        ln_pre_b=jnp.zeros((1, width), jnp.float32),
        ln_post_w=jnp.ones((1, width), jnp.float32),
        ln_post_b=jnp.zeros((1, width), jnp.float32),
        proj=proj,
        blocks=blocks,
    )


def vit_reference(x, params, *, patch_size, num_heads):
    """Pure-JAX f32 reference mirroring the PyTorch forward, for correctness."""
    B, C, H, W = x.shape
    p = patch_size
    gh, gw = H // p, W // p
    Np = gh * gw
    D = params["conv_w"].shape[1]

    def ln(t, w, b):
        mu = t.mean(-1, keepdims=True)
        var = ((t - mu) ** 2).mean(-1, keepdims=True)
        return (t - mu) / jnp.sqrt(var + EPS) * w + b

    patches = (
        x.reshape(B, C, gh, p, gw, p).transpose(0, 2, 4, 1, 3, 5).reshape(B, Np, C * p * p)
    )
    emb = patches @ params["conv_w"]
    cls = jnp.broadcast_to(params["class_emb"].reshape(1, 1, D), (B, 1, D))
    t = jnp.concatenate([cls, emb], axis=1) + params["pos_emb"][None]
    t = ln(t, params["ln_pre_w"][0], params["ln_pre_b"][0])

    L = Np + 1
    hd = D // num_heads
    for blk in params["blocks"]:
        h = ln(t, blk["ln1_w"][0], blk["ln1_b"][0])
        qkv = h @ blk["w_qkv"] + blk["b_qkv"][0]
        q, k, v = jnp.split(qkv, 3, axis=-1)
        q = q * (hd ** -0.5)
        qh = q.reshape(B, L, num_heads, hd).transpose(0, 2, 1, 3)
        kh = k.reshape(B, L, num_heads, hd).transpose(0, 2, 1, 3)
        vh = v.reshape(B, L, num_heads, hd).transpose(0, 2, 1, 3)
        s = jnp.einsum("bhqd,bhkd->bhqk", qh, kh)
        pattn = jax.nn.softmax(s, axis=-1)
        o = jnp.einsum("bhqk,bhkd->bhqd", pattn, vh).transpose(0, 2, 1, 3).reshape(B, L, D)
        t = t + (o @ blk["w_out"] + blk["b_out"][0])
        h2 = ln(t, blk["ln2_w"][0], blk["ln2_b"][0])
        m = h2 @ blk["w_fc"] + blk["b_fc"][0]
        m = m * jax.nn.sigmoid(1.702 * m)
        t = t + (m @ blk["w_proj"] + blk["b_proj"][0])

    cls_tok = t[:, 0, :]
    return ln(cls_tok, params["ln_post_w"][0], params["ln_post_b"][0]) @ params["proj"]


if __name__ == "__main__":
    # Small VisionTransformer: input_resolution=32, patch_size=8 -> 16 patches (+1 cls),
    # width=64, layers=2, heads=2, output_dim=32.
    B, C, RES = 2, 3, 32
    PATCH, WIDTH, LAYERS, HEADS, OUT_DIM = 8, 64, 2, 2, 32

    key = jax.random.PRNGKey(0)
    kx, kp = jax.random.split(key)
    x = jax.random.normal(kx, (B, C, RES, RES), jnp.float32)
    params = init_params(
        kp, input_resolution=RES, patch_size=PATCH, width=WIDTH,
        layers=LAYERS, heads=HEADS, output_dim=OUT_DIM,
    )

    fwd = jax.jit(functools.partial(vit_forward, patch_size=PATCH, num_heads=HEADS))
    out = jax.block_until_ready(fwd(x, params))

    ref = vit_reference(x, params, patch_size=PATCH, num_heads=HEADS)
    assert out.shape == (B, OUT_DIM), out.shape
    # bf16 MXU inputs (f32 accumulation) vs pure-f32 reference -> slightly looser tol.
    max_err = float(jnp.max(jnp.abs(out - ref)))
    assert jnp.allclose(out, ref, atol=5e-2, rtol=5e-2), max_err
    print("KERNEL_OK")
</pallas_src>

<mosaic_0001>
module attributes {stable_mosaic.version = 11 : i64} {
  func.func @_embed_pre_kernel(%arg0: i32, %arg1: memref<1x16x192xbf16, #tpu.memory_space<vmem>>, %arg2: memref<192x64xbf16, #tpu.memory_space<vmem>>, %arg3: memref<1x64xf32, #tpu.memory_space<vmem>>, %arg4: memref<17x64xf32, #tpu.memory_space<vmem>>, %arg5: memref<1x64xf32, #tpu.memory_space<vmem>>, %arg6: memref<1x64xf32, #tpu.memory_space<vmem>>, %arg7: memref<1x24x64xf32, #tpu.memory_space<vmem>>) attributes {dimension_semantics = [#tpu.dimension_semantics<parallel>], iteration_bounds = array<i64: 2>, scalar_prefetch = 0 : i64, scratch_operands = 0 : i64, tpu.core_type = #tpu.core_type<tc>, window_params = [{transform_indices = @transform_0, window_bounds = array<i64: 1, 16, 192>}, {pipeline_mode = #tpu.pipeline_mode<synchronous>, transform_indices = @transform_1, window_bounds = array<i64: 192, 64>}, {pipeline_mode = #tpu.pipeline_mode<synchronous>, transform_indices = @transform_2, window_bounds = array<i64: 1, 64>}, {pipeline_mode = #tpu.pipeline_mode<synchronous>, transform_indices = @transform_3, window_bounds = array<i64: 17, 64>}, {pipeline_mode = #tpu.pipeline_mode<synchronous>, transform_indices = @transform_4, window_bounds = array<i64: 1, 64>}, {pipeline_mode = #tpu.pipeline_mode<synchronous>, transform_indices = @transform_5, window_bounds = array<i64: 1, 64>}, {transform_indices = @transform_6, window_bounds = array<i64: 1, 24, 64>}]} {
    %c0 = arith.constant 0 : index
    %c0_0 = arith.constant 0 : index
    %c0_1 = arith.constant 0 : index
    %0 = vector.load %arg1[%c0, %c0_0, %c0_1] : memref<1x16x192xbf16, #tpu.memory_space<vmem>>, vector<1x16x192xbf16>
    %1 = vector.shape_cast %0 : vector<1x16x192xbf16> to vector<16x192xbf16>
    %c0_2 = arith.constant 0 : index
    %c0_3 = arith.constant 0 : index
    %2 = vector.load %arg2[%c0_2, %c0_3] : memref<192x64xbf16, #tpu.memory_space<vmem>>, vector<192x64xbf16>
    %cst = arith.constant dense<0.000000e+00> : vector<16x64xf32>
    %3 = tpu.matmul %1, %2, %cst {dimension_numbers = #tpu.dot_dimension_numbers<[1], [0], [0], [1], [0, 0, 1, 1], [], []>} : vector<16x192xbf16>, vector<192x64xbf16>, vector<16x64xf32> -> vector<16x64xf32>
    %c0_4 = arith.constant 0 : index
    %c0_5 = arith.constant 0 : index
    %4 = vector.load %arg3[%c0_4, %c0_5] : memref<1x64xf32, #tpu.memory_space<vmem>>, vector<1x64xf32>
    %c0_6 = arith.constant 0 : index
    %c0_7 = arith.constant 0 : index
    %5 = vector.load %arg4[%c0_6, %c0_7] : memref<17x64xf32, #tpu.memory_space<vmem>>, vector<1x64xf32>
    %6 = arith.addf %4, %5 : vector<1x64xf32>
    %c0_8 = arith.constant 0 : index
    %c0_9 = arith.constant 0 : index
    %7 = vector.load %arg5[%c0_8, %c0_9] : memref<1x64xf32, #tpu.memory_space<vmem>>, vector<1x64xf32>
    %c0_10 = arith.constant 0 : index
    %c0_11 = arith.constant 0 : index
    %8 = vector.load %arg6[%c0_10, %c0_11] : memref<1x64xf32, #tpu.memory_space<vmem>>, vector<1x64xf32>
    %cst_12 = arith.constant dense<0.000000e+00> : vector<1xf32>
    %9 = vector.multi_reduction <add>, %6, %cst_12 [1] : vector<1x64xf32> to vector<1xf32>
    %10 = vector.shape_cast %9 : vector<1xf32> to vector<1x1xf32>
    %cst_13 = arith.constant 6.400000e+01 : f32
    %11 = vector.broadcast %cst_13 : f32 to vector<1x1xf32>
    %12 = arith.divf %10, %11 : vector<1x1xf32>
    %13 = vector.broadcast %12 : vector<1x1xf32> to vector<1x64xf32>
    %14 = arith.subf %6, %13 : vector<1x64xf32>
    %15 = arith.mulf %14, %14 : vector<1x64xf32>
    %cst_14 = arith.constant dense<0.000000e+00> : vector<1xf32>
    %16 = vector.multi_reduction <add>, %15, %cst_14 [1] : vector<1x64xf32> to vector<1xf32>
    %17 = vector.shape_cast %16 : vector<1xf32> to vector<1x1xf32>
    %cst_15 = arith.constant 6.400000e+01 : f32
    %18 = vector.broadcast %cst_15 : f32 to vector<1x1xf32>
    %19 = arith.divf %17, %18 : vector<1x1xf32>
    %20 = vector.broadcast %12 : vector<1x1xf32> to vector<1x64xf32>
    %21 = arith.subf %6, %20 : vector<1x64xf32>
    %cst_16 = arith.constant 9.99999974E-6 : f32
    %22 = vector.broadcast %cst_16 : f32 to vector<1x1xf32>
    %23 = arith.addf %19, %22 : vector<1x1xf32>
    %24 = math.rsqrt %23 : vector<1x1xf32>
    %25 = vector.broadcast %24 : vector<1x1xf32> to vector<1x64xf32>
    %26 = arith.mulf %21, %25 : vector<1x64xf32>
    %27 = arith.mulf %26, %7 : vector<1x64xf32>
    %28 = arith.addf %27, %8 : vector<1x64xf32>
    %c1 = arith.constant 1 : index
    %c0_17 = arith.constant 0 : index
    %29 = vector.load %arg4[%c1, %c0_17] : memref<17x64xf32, #tpu.memory_space<vmem>>, vector<16x64xf32>
    %30 = arith.addf %3, %29 : vector<16x64xf32>
    %c0_18 = arith.constant 0 : index
    %c0_19 = arith.constant 0 : index
    %31 = vector.load %arg5[%c0_18, %c0_19] : memref<1x64xf32, #tpu.memory_space<vmem>>, vector<1x64xf32>
    %c0_20 = arith.constant 0 : index
    %c0_21 = arith.constant 0 : index
    %32 = vector.load %arg6[%c0_20, %c0_21] : memref<1x64xf32, #tpu.memory_space<vmem>>, vector<1x64xf32>
    %cst_22 = arith.constant dense<0.000000e+00> : vector<16xf32>
    %33 = vector.multi_reduction <add>, %30, %cst_22 [1] : vector<16x64xf32> to vector<16xf32>
    %34 = vector.shape_cast %33 : vector<16xf32> to vector<16x1xf32>
    %cst_23 = arith.constant 6.400000e+01 : f32
    %35 = vector.broadcast %cst_23 : f32 to vector<16x1xf32>
    %36 = arith.divf %34, %35 : vector<16x1xf32>
    %37 = vector.broadcast %36 : vector<16x1xf32> to vector<16x64xf32>
    %38 = arith.subf %30, %37 : vector<16x64xf32>
    %39 = arith.mulf %38, %38 : vector<16x64xf32>
    %cst_24 = arith.constant dense<0.000000e+00> : vector<16xf32>
    %40 = vector.multi_reduction <add>, %39, %cst_24 [1] : vector<16x64xf32> to vector<16xf32>
    %41 = vector.shape_cast %40 : vector<16xf32> to vector<16x1xf32>
    %cst_25 = arith.constant 6.400000e+01 : f32
    %42 = vector.broadcast %cst_25 : f32 to vector<16x1xf32>
    %43 = arith.divf %41, %42 : vector<16x1xf32>
    %44 = vector.broadcast %36 : vector<16x1xf32> to vector<16x64xf32>
    %45 = arith.subf %30, %44 : vector<16x64xf32>
    %cst_26 = arith.constant 9.99999974E-6 : f32
    %46 = vector.broadcast %cst_26 : f32 to vector<16x1xf32>
    %47 = arith.addf %43, %46 : vector<16x1xf32>
    %48 = math.rsqrt %47 : vector<16x1xf32>
    %49 = vector.broadcast %48 : vector<16x1xf32> to vector<16x64xf32>
    %50 = arith.mulf %45, %49 : vector<16x64xf32>
    %51 = vector.broadcast %31 : vector<1x64xf32> to vector<16x64xf32>
    %52 = arith.mulf %50, %51 : vector<16x64xf32>
    %53 = vector.broadcast %32 : vector<1x64xf32> to vector<16x64xf32>
    %54 = arith.addf %52, %53 : vector<16x64xf32>
    %55 = vector.shape_cast %28 : vector<1x64xf32> to vector<1x1x64xf32>
    %c0_27 = arith.constant 0 : index
    %c0_28 = arith.constant 0 : index
    %c0_29 = arith.constant 0 : index
    %56 = vector.load %arg7[%c0_27, %c0_28, %c0_29] : memref<1x24x64xf32, #tpu.memory_space<vmem>>, vector<1x1x64xf32>
    tpu.vector_store %arg7[%c0_27, %c0_28, %c0_29], %55 {strides = array<i32>} : memref<1x24x64xf32, #tpu.memory_space<vmem>>, vector<1x1x64xf32>,
    %57 = vector.shape_cast %54 : vector<16x64xf32> to vector<1x16x64xf32>
    %c0_30 = arith.constant 0 : index
    %c1_31 = arith.constant 1 : index
    %c0_32 = arith.constant 0 : index
    %58 = vector.load %arg7[%c0_30, %c1_31, %c0_32] : memref<1x24x64xf32, #tpu.memory_space<vmem>>, vector<1x16x64xf32>
    tpu.vector_store %arg7[%c0_30, %c1_31, %c0_32], %57 {strides = array<i32>} : memref<1x24x64xf32, #tpu.memory_space<vmem>>, vector<1x16x64xf32>,
    %cst_33 = arith.constant 0.000000e+00 : f32
    %59 = vector.broadcast %cst_33 : f32 to vector<1x7x64xf32>
    %c0_34 = arith.constant 0 : index
    %c17 = arith.constant 17 : index
    %c0_35 = arith.constant 0 : index
    %60 = vector.load %arg7[%c0_34, %c17, %c0_35] : memref<1x24x64xf32, #tpu.memory_space<vmem>>, vector<1x7x64xf32>
    tpu.vector_store %arg7[%c0_34, %c17, %c0_35], %59 {strides = array<i32>} : memref<1x24x64xf32, #tpu.memory_space<vmem>>, vector<1x7x64xf32>,
    return
  }
  func.func @transform_0(%arg0: i32) -> (i32, i32, i32) {
    %c0_i32 = arith.constant 0 : i32
    %c0_i32_0 = arith.constant 0 : i32
    %c0_i32_1 = arith.constant 0 : i32
    return %arg0, %c0_i32, %c0_i32_0 : i32, i32, i32
  }
  func.func @transform_1(%arg0: i32) -> (i32, i32) {
    %c0_i32 = arith.constant 0 : i32
    %c0_i32_0 = arith.constant 0 : i32
    %c0_i32_1 = arith.constant 0 : i32
    return %c0_i32, %c0_i32_0 : i32, i32
  }
  func.func @transform_2(%arg0: i32) -> (i32, i32) {
    %c0_i32 = arith.constant 0 : i32
    %c0_i32_0 = arith.constant 0 : i32
    %c0_i32_1 = arith.constant 0 : i32
    return %c0_i32, %c0_i32_0 : i32, i32
  }
  func.func @transform_3(%arg0: i32) -> (i32, i32) {
    %c0_i32 = arith.constant 0 : i32
    %c0_i32_0 = arith.constant 0 : i32
    %c0_i32_1 = arith.constant 0 : i32
    return %c0_i32, %c0_i32_0 : i32, i32
  }
  func.func @transform_4(%arg0: i32) -> (i32, i32) {
    %c0_i32 = arith.constant 0 : i32
    %c0_i32_0 = arith.constant 0 : i32
    %c0_i32_1 = arith.constant 0 : i32
    return %c0_i32, %c0_i32_0 : i32, i32
  }
  func.func @transform_5(%arg0: i32) -> (i32, i32) {
    %c0_i32 = arith.constant 0 : i32
    %c0_i32_0 = arith.constant 0 : i32
    %c0_i32_1 = arith.constant 0 : i32
    return %c0_i32, %c0_i32_0 : i32, i32
  }
  func.func @transform_6(%arg0: i32) -> (i32, i32, i32) {
    %c0_i32 = arith.constant 0 : i32
    %c0_i32_0 = arith.constant 0 : i32
    %c0_i32_1 = arith.constant 0 : i32
    return %arg0, %c0_i32, %c0_i32_0 : i32, i32, i32
  }
}

module attributes {stable_mosaic.version = 11 : i64} {
  func.func @_block_kernel(%arg0: i32, %arg1: memref<1x24x64xf32, #tpu.memory_space<vmem>>, %arg2: memref<1x64xf32, #tpu.memory_space<vmem>>, %arg3: memref<1x64xf32, #tpu.memory_space<vmem>>, %arg4: memref<64x192xbf16, #tpu.memory_space<vmem>>, %arg5: memref<1x192xf32, #tpu.memory_space<vmem>>, %arg6: memref<64x64xbf16, #tpu.memory_space<vmem>>, %arg7: memref<1x64xf32, #tpu.memory_space<vmem>>, %arg8: memref<1x64xf32, #tpu.memory_space<vmem>>, %arg9: memref<1x64xf32, #tpu.memory_space<vmem>>, %arg10: memref<64x256xbf16, #tpu.memory_space<vmem>>, %arg11: memref<1x256xf32, #tpu.memory_space<vmem>>, %arg12: memref<256x64xbf16, #tpu.memory_space<vmem>>, %arg13: memref<1x64xf32, #tpu.memory_space<vmem>>, %arg14: memref<1x24x64xf32, #tpu.memory_space<vmem>>, %arg15: memref<1x24x64xf32, #tpu.memory_space<vmem>>) attributes {dimension_semantics = [#tpu.dimension_semantics<parallel>], iteration_bounds = array<i64: 2>, scalar_prefetch = 0 : i64, scratch_operands = 1 : i64, tpu.core_type = #tpu.core_type<tc>, window_params = [{transform_indices = @transform_0, window_bounds = array<i64: 1, 24, 64>}, {pipeline_mode = #tpu.pipeline_mode<synchronous>, transform_indices = @transform_1, window_bounds = array<i64: 1, 64>}, {pipeline_mode = #tpu.pipeline_mode<synchronous>, transform_indices = @transform_2, window_bounds = array<i64: 1, 64>}, {pipeline_mode = #tpu.pipeline_mode<synchronous>, transform_indices = @transform_3, window_bounds = array<i64: 64, 192>}, {pipeline_mode = #tpu.pipeline_mode<synchronous>, transform_indices = @transform_4, window_bounds = array<i64: 1, 192>}, {pipeline_mode = #tpu.pipeline_mode<synchronous>, transform_indices = @transform_5, window_bounds = array<i64: 64, 64>}, {pipeline_mode = #tpu.pipeline_mode<synchronous>, transform_indices = @transform_6, window_bounds = array<i64: 1, 64>}, {pipeline_mode = #tpu.pipeline_mode<synchronous>, transform_indices = @transform_7, window_bounds = array<i64: 1, 64>}, {pipeline_mode = #tpu.pipeline_mode<synchronous>, transform_indices = @transform_8, window_bounds = array<i64: 1, 64>}, {pipeline_mode = #tpu.pipeline_mode<synchronous>, transform_indices = @transform_9, window_bounds = array<i64: 64, 256>}, {pipeline_mode = #tpu.pipeline_mode<synchronous>, transform_indices = @transform_10, window_bounds = array<i64: 1, 256>}, {pipeline_mode = #tpu.pipeline_mode<synchronous>, transform_indices = @transform_11, window_bounds = array<i64: 256, 64>}, {pipeline_mode = #tpu.pipeline_mode<synchronous>, transform_indices = @transform_12, window_bounds = array<i64: 1, 64>}, {transform_indices = @transform_13, window_bounds = array<i64: 1, 24, 64>}]} {
    %c0 = arith.constant 0 : index
    %c0_0 = arith.constant 0 : index
    %c0_1 = arith.constant 0 : index
    %0 = vector.load %arg1[%c0, %c0_0, %c0_1] : memref<1x24x64xf32, #tpu.memory_space<vmem>>, vector<1x24x64xf32>
    %1 = vector.shape_cast %0 : vector<1x24x64xf32> to vector<24x64xf32>
    %c0_2 = arith.constant 0 : index
    %c0_3 = arith.constant 0 : index
    %2 = vector.load %arg2[%c0_2, %c0_3] : memref<1x64xf32, #tpu.memory_space<vmem>>, vector<1x64xf32>
    %c0_4 = arith.constant 0 : index
    %c0_5 = arith.constant 0 : index
    %3 = vector.load %arg3[%c0_4, %c0_5] : memref<1x64xf32, #tpu.memory_space<vmem>>, vector<1x64xf32>
    %cst = arith.constant dense<0.000000e+00> : vector<24xf32>
    %4 = vector.multi_reduction <add>, %1, %cst [1] : vector<24x64xf32> to vector<24xf32>
    %5 = vector.shape_cast %4 : vector<24xf32> to vector<24x1xf32>
    %cst_6 = arith.constant 6.400000e+01 : f32
    %6 = vector.broadcast %cst_6 : f32 to vector<24x1xf32>
    %7 = arith.divf %5, %6 : vector<24x1xf32>
    %8 = vector.broadcast %7 : vector<24x1xf32> to vector<24x64xf32>
    %9 = arith.subf %1, %8 : vector<24x64xf32>
    %10 = arith.mulf %9, %9 : vector<24x64xf32>
    %cst_7 = arith.constant dense<0.000000e+00> : vector<24xf32>
    %11 = vector.multi_reduction <add>, %10, %cst_7 [1] : vector<24x64xf32> to vector<24xf32>
    %12 = vector.shape_cast %11 : vector<24xf32> to vector<24x1xf32>
    %cst_8 = arith.constant 6.400000e+01 : f32
    %13 = vector.broadcast %cst_8 : f32 to vector<24x1xf32>
    %14 = arith.divf %12, %13 : vector<24x1xf32>
    %15 = vector.broadcast %7 : vector<24x1xf32> to vector<24x64xf32>
    %16 = arith.subf %1, %15 : vector<24x64xf32>
    %cst_9 = arith.constant 9.99999974E-6 : f32
    %17 = vector.broadcast %cst_9 : f32 to vector<24x1xf32>
    %18 = arith.addf %14, %17 : vector<24x1xf32>
    %19 = math.rsqrt %18 : vector<24x1xf32>
    %20 = vector.broadcast %19 : vector<24x1xf32> to vector<24x64xf32>
    %21 = arith.mulf %16, %20 : vector<24x64xf32>
    %22 = vector.broadcast %2 : vector<1x64xf32> to vector<24x64xf32>
    %23 = arith.mulf %21, %22 : vector<24x64xf32>
    %24 = vector.broadcast %3 : vector<1x64xf32> to vector<24x64xf32>
    %25 = arith.addf %23, %24 : vector<24x64xf32>
    %26 = arith.truncf %25 : vector<24x64xf32> to vector<24x64xbf16>
    %c0_10 = arith.constant 0 : index
    %c0_11 = arith.constant 0 : index
    %27 = vector.load %arg4[%c0_10, %c0_11] : memref<64x192xbf16, #tpu.memory_space<vmem>>, vector<64x192xbf16>
    %cst_12 = arith.constant dense<0.000000e+00> : vector<24x192xf32>
    %28 = tpu.matmul %26, %27, %cst_12 {dimension_numbers = #tpu.dot_dimension_numbers<[1], [0], [0], [1], [0, 0, 1, 1], [], []>} : vector<24x64xbf16>, vector<64x192xbf16>, vector<24x192xf32> -> vector<24x192xf32>
    %c0_13 = arith.constant 0 : index
    %c0_14 = arith.constant 0 : index
    %29 = vector.load %arg5[%c0_13, %c0_14] : memref<1x192xf32, #tpu.memory_space<vmem>>, vector<1x192xf32>
    %30 = vector.broadcast %29 : vector<1x192xf32> to vector<24x192xf32>
    %31 = arith.addf %28, %30 : vector<24x192xf32>
    %32 = vector.extract_strided_slice %31 {offsets = [0, 0], sizes = [24, 64], strides = [1, 1]} : vector<24x192xf32> to vector<24x64xf32>
    %cst_15 = arith.constant 0.176776692 : f32
    %33 = vector.broadcast %cst_15 : f32 to vector<24x64xf32>
    %34 = arith.mulf %32, %33 : vector<24x64xf32>
    %35 = vector.shape_cast %34 : vector<24x64xf32> to vector<1x24x64xf32>
    %36 = vector.extract_strided_slice %31 {offsets = [0, 64], sizes = [24, 64], strides = [1, 1]} : vector<24x192xf32> to vector<24x64xf32>
    %37 = vector.shape_cast %36 : vector<24x64xf32> to vector<1x24x64xf32>
    %38 = vector.extract_strided_slice %31 {offsets = [0, 128], sizes = [24, 64], strides = [1, 1]} : vector<24x192xf32> to vector<24x64xf32>
    %39 = vector.shape_cast %38 : vector<24x64xf32> to vector<1x24x64xf32>
    %40 = tpu.iota {dimensions = array<i32: 2>} : vector<1x1x24xi32>
    %c17_i32 = arith.constant 17 : i32
    %41 = vector.broadcast %c17_i32 : i32 to vector<1x1x24xi32>
    %42 = arith.cmpi slt, %40, %41 : vector<1x1x24xi32>
    %43 = vector.extract_strided_slice %35 {offsets = [0, 0, 0], sizes = [1, 24, 32], strides = [1, 1, 1]} : vector<1x24x64xf32> to vector<1x24x32xf32>
    %44 = arith.truncf %43 : vector<1x24x32xf32> to vector<1x24x32xbf16>
    %45 = vector.extract_strided_slice %37 {offsets = [0, 0, 0], sizes = [1, 24, 32], strides = [1, 1, 1]} : vector<1x24x64xf32> to vector<1x24x32xf32>
    %46 = arith.truncf %45 : vector<1x24x32xf32> to vector<1x24x32xbf16>
    %47 = vector.extract_strided_slice %39 {offsets = [0, 0, 0], sizes = [1, 24, 32], strides = [1, 1, 1]} : vector<1x24x64xf32> to vector<1x24x32xf32>
    %48 = arith.truncf %47 : vector<1x24x32xf32> to vector<1x24x32xbf16>
    "tpu.trace_start"() <{level = 10 : i32, message = "bqd,bkd->bqk"}> : () -> ()
    %cst_16 = arith.constant dense<0.000000e+00> : vector<1x24x24xf32>
    %49 = tpu.matmul %44, %46, %cst_16 {dimension_numbers = #tpu.dot_dimension_numbers<[2], [2], [1], [1], [0, 0, 0, 1, 1, 1], [0], [0]>} : vector<1x24x32xbf16>, vector<1x24x32xbf16>, vector<1x24x24xf32> -> vector<1x24x24xf32>
    %cst_17 = arith.constant -1.000000e+30 : f32
    "tpu.trace_stop"() : () -> ()
    %50 = vector.shape_cast %42 : vector<1x1x24xi1> to vector<1x1x24xi1>
    %51 = vector.broadcast %50 : vector<1x1x24xi1> to vector<1x24x24xi1>
    %52 = vector.broadcast %cst_17 : f32 to vector<1x24x24xf32>
    %53 = arith.select %51, %49, %52 : vector<1x24x24xi1>, vector<1x24x24xf32>
    %cst_18 = arith.constant dense<0xFF800000> : vector<1x24xf32>
    %54 = vector.multi_reduction <maximumf>, %53, %cst_18 [2] : vector<1x24x24xf32> to vector<1x24xf32>
    %55 = vector.shape_cast %54 : vector<1x24xf32> to vector<1x24x1xf32>
    %56 = vector.broadcast %55 : vector<1x24x1xf32> to vector<1x24x24xf32>
    %57 = arith.subf %53, %56 : vector<1x24x24xf32>
    %58 = math.exp %57 : vector<1x24x24xf32>
    %cst_19 = arith.constant dense<0.000000e+00> : vector<1x24xf32>
    %59 = vector.multi_reduction <add>, %58, %cst_19 [2] : vector<1x24x24xf32> to vector<1x24xf32>
    %60 = vector.shape_cast %59 : vector<1x24xf32> to vector<1x24x1xf32>
    %61 = tpu.reciprocal %60 {approx = true} : vector<1x24x1xf32> -> vector<1x24x1xf32>
    %62 = vector.broadcast %61 : vector<1x24x1xf32> to vector<1x24x24xf32>
    %63 = arith.mulf %58, %62 : vector<1x24x24xf32>
    %64 = arith.truncf %63 : vector<1x24x24xf32> to vector<1x24x24xbf16>
    "tpu.trace_start"() <{level = 10 : i32, message = "bqk,bkd->bqd"}> : () -> ()
    %cst_20 = arith.constant dense<0.000000e+00> : vector<1x24x32xf32>
    %65 = tpu.matmul %64, %48, %cst_20 {dimension_numbers = #tpu.dot_dimension_numbers<[2], [1], [1], [2], [0, 0, 0, 1, 1, 2], [0], [0]>} : vector<1x24x24xbf16>, vector<1x24x32xbf16>, vector<1x24x32xf32> -> vector<1x24x32xf32>
    "tpu.trace_stop"() : () -> ()
    %c0_21 = arith.constant 0 : index
    %c0_22 = arith.constant 0 : index
    %c0_23 = arith.constant 0 : index
    %66 = vector.load %arg15[%c0_21, %c0_22, %c0_23] : memref<1x24x64xf32, #tpu.memory_space<vmem>>, vector<1x24x32xf32>
    tpu.vector_store %arg15[%c0_21, %c0_22, %c0_23], %65 {strides = array<i32>} : memref<1x24x64xf32, #tpu.memory_space<vmem>>, vector<1x24x32xf32>,
    %67 = vector.extract_strided_slice %35 {offsets = [0, 0, 32], sizes = [1, 24, 32], strides = [1, 1, 1]} : vector<1x24x64xf32> to vector<1x24x32xf32>
    %68 = arith.truncf %67 : vector<1x24x32xf32> to vector<1x24x32xbf16>
    %69 = vector.extract_strided_slice %37 {offsets = [0, 0, 32], sizes = [1, 24, 32], strides = [1, 1, 1]} : vector<1x24x64xf32> to vector<1x24x32xf32>
    %70 = arith.truncf %69 : vector<1x24x32xf32> to vector<1x24x32xbf16>
    %71 = vector.extract_strided_slice %39 {offsets = [0, 0, 32], sizes = [1, 24, 32], strides = [1, 1, 1]} : vector<1x24x64xf32> to vector<1x24x32xf32>
    %72 = arith.truncf %71 : vector<1x24x32xf32> to vector<1x24x32xbf16>
    "tpu.trace_start"() <{level = 10 : i32, message = "bqd,bkd->bqk"}> : () -> ()
    %cst_24 = arith.constant dense<0.000000e+00> : vector<1x24x24xf32>
    %73 = tpu.matmul %68, %70, %cst_24 {dimension_numbers = #tpu.dot_dimension_numbers<[2], [2], [1], [1], [0, 0, 0, 1, 1, 1], [0], [0]>} : vector<1x24x32xbf16>, vector<1x24x32xbf16>, vector<1x24x24xf32> -> vector<1x24x24xf32>
    %cst_25 = arith.constant -1.000000e+30 : f32
    "tpu.trace_stop"() : () -> ()
    %74 = vector.shape_cast %42 : vector<1x1x24xi1> to vector<1x1x24xi1>
    %75 = vector.broadcast %74 : vector<1x1x24xi1> to vector<1x24x24xi1>
    %76 = vector.broadcast %cst_25 : f32 to vector<1x24x24xf32>
    %77 = arith.select %75, %73, %76 : vector<1x24x24xi1>, vector<1x24x24xf32>
    %cst_26 = arith.constant dense<0xFF800000> : vector<1x24xf32>
    %78 = vector.multi_reduction <maximumf>, %77, %cst_26 [2] : vector<1x24x24xf32> to vector<1x24xf32>
    %79 = vector.shape_cast %78 : vector<1x24xf32> to vector<1x24x1xf32>
    %80 = vector.broadcast %79 : vector<1x24x1xf32> to vector<1x24x24xf32>
    %81 = arith.subf %77, %80 : vector<1x24x24xf32>
    %82 = math.exp %81 : vector<1x24x24xf32>
    %cst_27 = arith.constant dense<0.000000e+00> : vector<1x24xf32>
    %83 = vector.multi_reduction <add>, %82, %cst_27 [2] : vector<1x24x24xf32> to vector<1x24xf32>
    %84 = vector.shape_cast %83 : vector<1x24xf32> to vector<1x24x1xf32>
    %85 = tpu.reciprocal %84 {approx = true} : vector<1x24x1xf32> -> vector<1x24x1xf32>
    %86 = vector.broadcast %85 : vector<1x24x1xf32> to vector<1x24x24xf32>
    %87 = arith.mulf %82, %86 : vector<1x24x24xf32>
    %88 = arith.truncf %87 : vector<1x24x24xf32> to vector<1x24x24xbf16>
    "tpu.trace_start"() <{level = 10 : i32, message = "bqk,bkd->bqd"}> : () -> ()
    %cst_28 = arith.constant dense<0.000000e+00> : vector<1x24x32xf32>
    %89 = tpu.matmul %88, %72, %cst_28 {dimension_numbers = #tpu.dot_dimension_numbers<[2], [1], [1], [2], [0, 0, 0, 1, 1, 2], [0], [0]>} : vector<1x24x24xbf16>, vector<1x24x32xbf16>, vector<1x24x32xf32> -> vector<1x24x32xf32>
    "tpu.trace_stop"() : () -> ()
    %c0_29 = arith.constant 0 : index
    %c0_30 = arith.constant 0 : index
    %c32 = arith.constant 32 : index
    %90 = vector.load %arg15[%c0_29, %c0_30, %c32] : memref<1x24x64xf32, #tpu.memory_space<vmem>>, vector<1x24x32xf32>
    tpu.vector_store %arg15[%c0_29, %c0_30, %c32], %89 {strides = array<i32>} : memref<1x24x64xf32, #tpu.memory_space<vmem>>, vector<1x24x32xf32>,
    %c0_31 = arith.constant 0 : index
    %c0_32 = arith.constant 0 : index
    %c0_33 = arith.constant 0 : index
    %91 = vector.load %arg15[%c0_31, %c0_32, %c0_33] : memref<1x24x64xf32, #tpu.memory_space<vmem>>, vector<1x24x64xf32>
    %92 = vector.shape_cast %91 : vector<1x24x64xf32> to vector<24x64xf32>
    %93 = arith.truncf %92 : vector<24x64xf32> to vector<24x64xbf16>
    %c0_34 = arith.constant 0 : index
    %c0_35 = arith.constant 0 : index
    %94 = vector.load %arg6[%c0_34, %c0_35] : memref<64x64xbf16, #tpu.memory_space<vmem>>, vector<64x64xbf16>
    %cst_36 = arith.constant dense<0.000000e+00> : vector<24x64xf32>
    %95 = tpu.matmul %93, %94, %cst_36 {dimension_numbers = #tpu.dot_dimension_numbers<[1], [0], [0], [1], [0, 0, 1, 1], [], []>} : vector<24x64xbf16>, vector<64x64xbf16>, vector<24x64xf32> -> vector<24x64xf32>
    %96 = arith.addf %1, %95 : vector<24x64xf32>
    %c0_37 = arith.constant 0 : index
    %c0_38 = arith.constant 0 : index
    %97 = vector.load %arg7[%c0_37, %c0_38] : memref<1x64xf32, #tpu.memory_space<vmem>>, vector<1x64xf32>
    %98 = vector.broadcast %97 : vector<1x64xf32> to vector<24x64xf32>
    %99 = arith.addf %96, %98 : vector<24x64xf32>
    %c0_39 = arith.constant 0 : index
    %c0_40 = arith.constant 0 : index
    %100 = vector.load %arg8[%c0_39, %c0_40] : memref<1x64xf32, #tpu.memory_space<vmem>>, vector<1x64xf32>
    %c0_41 = arith.constant 0 : index
    %c0_42 = arith.constant 0 : index
    %101 = vector.load %arg9[%c0_41, %c0_42] : memref<1x64xf32, #tpu.memory_space<vmem>>, vector<1x64xf32>
    %cst_43 = arith.constant dense<0.000000e+00> : vector<24xf32>
    %102 = vector.multi_reduction <add>, %99, %cst_43 [1] : vector<24x64xf32> to vector<24xf32>
    %103 = vector.shape_cast %102 : vector<24xf32> to vector<24x1xf32>
    %cst_44 = arith.constant 6.400000e+01 : f32
    %104 = vector.broadcast %cst_44 : f32 to vector<24x1xf32>
    %105 = arith.divf %103, %104 : vector<24x1xf32>
    %106 = vector.broadcast %105 : vector<24x1xf32> to vector<24x64xf32>
    %107 = arith.subf %99, %106 : vector<24x64xf32>
    %108 = arith.mulf %107, %107 : vector<24x64xf32>
    %cst_45 = arith.constant dense<0.000000e+00> : vector<24xf32>
    %109 = vector.multi_reduction <add>, %108, %cst_45 [1] : vector<24x64xf32> to vector<24xf32>
    %110 = vector.shape_cast %109 : vector<24xf32> to vector<24x1xf32>
    %cst_46 = arith.constant 6.400000e+01 : f32
    %111 = vector.broadcast %cst_46 : f32 to vector<24x1xf32>
    %112 = arith.divf %110, %111 : vector<24x1xf32>
    %113 = vector.broadcast %105 : vector<24x1xf32> to vector<24x64xf32>
    %114 = arith.subf %99, %113 : vector<24x64xf32>
    %cst_47 = arith.constant 9.99999974E-6 : f32
    %115 = vector.broadcast %cst_47 : f32 to vector<24x1xf32>
    %116 = arith.addf %112, %115 : vector<24x1xf32>
    %117 = math.rsqrt %116 : vector<24x1xf32>
    %118 = vector.broadcast %117 : vector<24x1xf32> to vector<24x64xf32>
    %119 = arith.mulf %114, %118 : vector<24x64xf32>
    %120 = vector.broadcast %100 : vector<1x64xf32> to vector<24x64xf32>
    %121 = arith.mulf %119, %120 : vector<24x64xf32>
    %122 = vector.broadcast %101 : vector<1x64xf32> to vector<24x64xf32>
    %123 = arith.addf %121, %122 : vector<24x64xf32>
    %124 = arith.truncf %123 : vector<24x64xf32> to vector<24x64xbf16>
    %c0_48 = arith.constant 0 : index
    %c0_49 = arith.constant 0 : index
    %125 = vector.load %arg10[%c0_48, %c0_49] : memref<64x256xbf16, #tpu.memory_space<vmem>>, vector<64x256xbf16>
    %cst_50 = arith.constant dense<0.000000e+00> : vector<24x256xf32>
    %126 = tpu.matmul %124, %125, %cst_50 {dimension_numbers = #tpu.dot_dimension_numbers<[1], [0], [0], [1], [0, 0, 1, 1], [], []>} : vector<24x64xbf16>, vector<64x256xbf16>, vector<24x256xf32> -> vector<24x256xf32>
    %c0_51 = arith.constant 0 : index
    %c0_52 = arith.constant 0 : index
    %127 = vector.load %arg11[%c0_51, %c0_52] : memref<1x256xf32, #tpu.memory_space<vmem>>, vector<1x256xf32>
    %128 = vector.broadcast %127 : vector<1x256xf32> to vector<24x256xf32>
    %129 = arith.addf %126, %128 : vector<24x256xf32>
    %cst_53 = arith.constant 1.702000e+00 : f32
    %130 = vector.broadcast %cst_53 : f32 to vector<24x256xf32>
    %131 = arith.mulf %130, %129 : vector<24x256xf32>
    %132 = arith.negf %131 : vector<24x256xf32>
    %133 = math.exp %132 : vector<24x256xf32>
    %cst_54 = arith.constant 1.000000e+00 : f32
    %134 = vector.broadcast %cst_54 : f32 to vector<24x256xf32>
    %135 = arith.addf %134, %133 : vector<24x256xf32>
    %136 = arith.divf %134, %135 : vector<24x256xf32>
    %137 = arith.mulf %129, %136 : vector<24x256xf32>
    %138 = arith.truncf %137 : vector<24x256xf32> to vector<24x256xbf16>
    %c0_55 = arith.constant 0 : index
    %c0_56 = arith.constant 0 : index
    %139 = vector.load %arg12[%c0_55, %c0_56] : memref<256x64xbf16, #tpu.memory_space<vmem>>, vector<256x64xbf16>
    %cst_57 = arith.constant dense<0.000000e+00> : vector<24x64xf32>
    %140 = tpu.matmul %138, %139, %cst_57 {dimension_numbers = #tpu.dot_dimension_numbers<[1], [0], [0], [1], [0, 0, 1, 1], [], []>} : vector<24x256xbf16>, vector<256x64xbf16>, vector<24x64xf32> -> vector<24x64xf32>
    %c0_58 = arith.constant 0 : index
    %c0_59 = arith.constant 0 : index
    %141 = vector.load %arg13[%c0_58, %c0_59] : memref<1x64xf32, #tpu.memory_space<vmem>>, vector<1x64xf32>
    %142 = vector.broadcast %141 : vector<1x64xf32> to vector<24x64xf32>
    %143 = arith.addf %140, %142 : vector<24x64xf32>
    %144 = arith.addf %99, %143 : vector<24x64xf32>
    %145 = vector.shape_cast %144 : vector<24x64xf32> to vector<1x24x64xf32>
    %c0_60 = arith.constant 0 : index
    %c0_61 = arith.constant 0 : index
    %c0_62 = arith.constant 0 : index
    %146 = vector.load %arg14[%c0_60, %c0_61, %c0_62] : memref<1x24x64xf32, #tpu.memory_space<vmem>>, vector<1x24x64xf32>
    tpu.vector_store %arg14[%c0_60, %c0_61, %c0_62], %145 {strides = array<i32>} : memref<1x24x64xf32, #tpu.memory_space<vmem>>, vector<1x24x64xf32>,
    return
  }
  func.func @transform_0(%arg0: i32) -> (i32, i32, i32) {
    %c0_i32 = arith.constant 0 : i32
    %c0_i32_0 = arith.constant 0 : i32
    %c0_i32_1 = arith.constant 0 : i32
    return %arg0, %c0_i32, %c0_i32_0 : i32, i32, i32
  }
  func.func @transform_1(%arg0: i32) -> (i32, i32) {
    %c0_i32 = arith.constant 0 : i32
    %c0_i32_0 = arith.constant 0 : i32
    %c0_i32_1 = arith.constant 0 : i32
    return %c0_i32, %c0_i32_0 : i32, i32
  }
  func.func @transform_2(%arg0: i32) -> (i32, i32) {
    %c0_i32 = arith.constant 0 : i32
    %c0_i32_0 = arith.constant 0 : i32
    %c0_i32_1 = arith.constant 0 : i32
    return %c0_i32, %c0_i32_0 : i32, i32
  }
  func.func @transform_3(%arg0: i32) -> (i32, i32) {
    %c0_i32 = arith.constant 0 : i32
    %c0_i32_0 = arith.constant 0 : i32
    %c0_i32_1 = arith.constant 0 : i32
    return %c0_i32, %c0_i32_0 : i32, i32
  }
  func.func @transform_4(%arg0: i32) -> (i32, i32) {
    %c0_i32 = arith.constant 0 : i32
    %c0_i32_0 = arith.constant 0 : i32
    %c0_i32_1 = arith.constant 0 : i32
    return %c0_i32, %c0_i32_0 : i32, i32
  }
  func.func @transform_5(%arg0: i32) -> (i32, i32) {
    %c0_i32 = arith.constant 0 : i32
    %c0_i32_0 = arith.constant 0 : i32
    %c0_i32_1 = arith.constant 0 : i32
    return %c0_i32, %c0_i32_0 : i32, i32
  }
  func.func @transform_6(%arg0: i32) -> (i32, i32) {
    %c0_i32 = arith.constant 0 : i32
    %c0_i32_0 = arith.constant 0 : i32
    %c0_i32_1 = arith.constant 0 : i32
    return %c0_i32, %c0_i32_0 : i32, i32
  }
  func.func @transform_7(%arg0: i32) -> (i32, i32) {
    %c0_i32 = arith.constant 0 : i32
    %c0_i32_0 = arith.constant 0 : i32
    %c0_i32_1 = arith.constant 0 : i32
    return %c0_i32, %c0_i32_0 : i32, i32
  }
  func.func @transform_8(%arg0: i32) -> (i32, i32) {
    %c0_i32 = arith.constant 0 : i32
    %c0_i32_0 = arith.constant 0 : i32
    %c0_i32_1 = arith.constant 0 : i32
    return %c0_i32, %c0_i32_0 : i32, i32
  }
  func.func @transform_9(%arg0: i32) -> (i32, i32) {
    %c0_i32 = arith.constant 0 : i32
    %c0_i32_0 = arith.constant 0 : i32
    %c0_i32_1 = arith.constant 0 : i32
    return %c0_i32, %c0_i32_0 : i32, i32
  }
  func.func @transform_10(%arg0: i32) -> (i32, i32) {
    %c0_i32 = arith.constant 0 : i32
    %c0_i32_0 = arith.constant 0 : i32
    %c0_i32_1 = arith.constant 0 : i32
    return %c0_i32, %c0_i32_0 : i32, i32
  }
  func.func @transform_11(%arg0: i32) -> (i32, i32) {
    %c0_i32 = arith.constant 0 : i32
    %c0_i32_0 = arith.constant 0 : i32
    %c0_i32_1 = arith.constant 0 : i32
    return %c0_i32, %c0_i32_0 : i32, i32
  }
  func.func @transform_12(%arg0: i32) -> (i32, i32) {
    %c0_i32 = arith.constant 0 : i32
    %c0_i32_0 = arith.constant 0 : i32
    %c0_i32_1 = arith.constant 0 : i32
    return %c0_i32, %c0_i32_0 : i32, i32
  }
  func.func @transform_13(%arg0: i32) -> (i32, i32, i32) {
    %c0_i32 = arith.constant 0 : i32
    %c0_i32_0 = arith.constant 0 : i32
    %c0_i32_1 = arith.constant 0 : i32
    return %arg0, %c0_i32, %c0_i32_0 : i32, i32, i32
  }
}

module attributes {stable_mosaic.version = 11 : i64} {
  func.func @_post_kernel(%arg0: i32, %arg1: memref<2x64xf32, #tpu.memory_space<vmem>>, %arg2: memref<1x64xf32, #tpu.memory_space<vmem>>, %arg3: memref<1x64xf32, #tpu.memory_space<vmem>>, %arg4: memref<64x32xbf16, #tpu.memory_space<vmem>>, %arg5: memref<2x32xf32, #tpu.memory_space<vmem>>) attributes {dimension_semantics = [#tpu.dimension_semantics<arbitrary>], iteration_bounds = array<i64: 1>, scalar_prefetch = 0 : i64, scratch_operands = 0 : i64, tpu.core_type = #tpu.core_type<tc>, window_params = [{pipeline_mode = #tpu.pipeline_mode<synchronous>, transform_indices = @transform_0, window_bounds = array<i64: 2, 64>}, {pipeline_mode = #tpu.pipeline_mode<synchronous>, transform_indices = @transform_1, window_bounds = array<i64: 1, 64>}, {pipeline_mode = #tpu.pipeline_mode<synchronous>, transform_indices = @transform_2, window_bounds = array<i64: 1, 64>}, {pipeline_mode = #tpu.pipeline_mode<synchronous>, transform_indices = @transform_3, window_bounds = array<i64: 64, 32>}, {pipeline_mode = #tpu.pipeline_mode<synchronous>, transform_indices = @transform_4, window_bounds = array<i64: 2, 32>}]} {
    %c0 = arith.constant 0 : index
    %c0_0 = arith.constant 0 : index
    %0 = vector.load %arg1[%c0, %c0_0] : memref<2x64xf32, #tpu.memory_space<vmem>>, vector<2x64xf32>
    %c0_1 = arith.constant 0 : index
    %c0_2 = arith.constant 0 : index
    %1 = vector.load %arg2[%c0_1, %c0_2] : memref<1x64xf32, #tpu.memory_space<vmem>>, vector<1x64xf32>
    %c0_3 = arith.constant 0 : index
    %c0_4 = arith.constant 0 : index
    %2 = vector.load %arg3[%c0_3, %c0_4] : memref<1x64xf32, #tpu.memory_space<vmem>>, vector<1x64xf32>
    %cst = arith.constant dense<0.000000e+00> : vector<2xf32>
    %3 = vector.multi_reduction <add>, %0, %cst [1] : vector<2x64xf32> to vector<2xf32>
    %4 = vector.shape_cast %3 : vector<2xf32> to vector<2x1xf32>
    %cst_5 = arith.constant 6.400000e+01 : f32
    %5 = vector.broadcast %cst_5 : f32 to vector<2x1xf32>
    %6 = arith.divf %4, %5 : vector<2x1xf32>
    %7 = vector.broadcast %6 : vector<2x1xf32> to vector<2x64xf32>
    %8 = arith.subf %0, %7 : vector<2x64xf32>
    %9 = arith.mulf %8, %8 : vector<2x64xf32>
    %cst_6 = arith.constant dense<0.000000e+00> : vector<2xf32>
    %10 = vector.multi_reduction <add>, %9, %cst_6 [1] : vector<2x64xf32> to vector<2xf32>
    %11 = vector.shape_cast %10 : vector<2xf32> to vector<2x1xf32>
    %cst_7 = arith.constant 6.400000e+01 : f32
    %12 = vector.broadcast %cst_7 : f32 to vector<2x1xf32>
    %13 = arith.divf %11, %12 : vector<2x1xf32>
    %14 = vector.broadcast %6 : vector<2x1xf32> to vector<2x64xf32>
    %15 = arith.subf %0, %14 : vector<2x64xf32>
    %cst_8 = arith.constant 9.99999974E-6 : f32
    %16 = vector.broadcast %cst_8 : f32 to vector<2x1xf32>
    %17 = arith.addf %13, %16 : vector<2x1xf32>
    %18 = math.rsqrt %17 : vector<2x1xf32>
    %19 = vector.broadcast %18 : vector<2x1xf32> to vector<2x64xf32>
    %20 = arith.mulf %15, %19 : vector<2x64xf32>
    %21 = vector.broadcast %1 : vector<1x64xf32> to vector<2x64xf32>
    %22 = arith.mulf %20, %21 : vector<2x64xf32>
    %23 = vector.broadcast %2 : vector<1x64xf32> to vector<2x64xf32>
    %24 = arith.addf %22, %23 : vector<2x64xf32>
    %25 = arith.truncf %24 : vector<2x64xf32> to vector<2x64xbf16>
    %c0_9 = arith.constant 0 : index
    %c0_10 = arith.constant 0 : index
    %26 = vector.load %arg4[%c0_9, %c0_10] : memref<64x32xbf16, #tpu.memory_space<vmem>>, vector<64x32xbf16>
    %cst_11 = arith.constant dense<0.000000e+00> : vector<2x32xf32>
    %27 = tpu.matmul %25, %26, %cst_11 {dimension_numbers = #tpu.dot_dimension_numbers<[1], [0], [0], [1], [0, 0, 1, 1], [], []>} : vector<2x64xbf16>, vector<64x32xbf16>, vector<2x32xf32> -> vector<2x32xf32>
    %c0_12 = arith.constant 0 : index
    %c0_13 = arith.constant 0 : index
    %28 = vector.load %arg5[%c0_12, %c0_13] : memref<2x32xf32, #tpu.memory_space<vmem>>, vector<2x32xf32>
    tpu.vector_store %arg5[%c0_12, %c0_13], %27 {strides = array<i32>} : memref<2x32xf32, #tpu.memory_space<vmem>>, vector<2x32xf32>,
    return
  }
  func.func @transform_0(%arg0: i32) -> (i32, i32) {
    %c0_i32 = arith.constant 0 : i32
    %c0_i32_0 = arith.constant 0 : i32
    %c0_i32_1 = arith.constant 0 : i32
    return %c0_i32, %c0_i32_0 : i32, i32
  }
  func.func @transform_1(%arg0: i32) -> (i32, i32) {
    %c0_i32 = arith.constant 0 : i32
    %c0_i32_0 = arith.constant 0 : i32
    %c0_i32_1 = arith.constant 0 : i32
    return %c0_i32, %c0_i32_0 : i32, i32
  }
  func.func @transform_2(%arg0: i32) -> (i32, i32) {
    %c0_i32 = arith.constant 0 : i32
    %c0_i32_0 = arith.constant 0 : i32
    %c0_i32_1 = arith.constant 0 : i32
    return %c0_i32, %c0_i32_0 : i32, i32
  }
  func.func @transform_3(%arg0: i32) -> (i32, i32) {
    %c0_i32 = arith.constant 0 : i32
    %c0_i32_0 = arith.constant 0 : i32
    %c0_i32_1 = arith.constant 0 : i32
    return %c0_i32, %c0_i32_0 : i32, i32
  }
  func.func @transform_4(%arg0: i32) -> (i32, i32) {
    %c0_i32 = arith.constant 0 : i32
    %c0_i32_0 = arith.constant 0 : i32
    %c0_i32_1 = arith.constant 0 : i32
    return %c0_i32, %c0_i32_0 : i32, i32
  }
}

</mosaic_0001>

<bundles_post_ra>
// kernel: vit_forward.7
= control target key start
LH: loop header
LB: loop body
LE: loop exit
PB: predicated region body
PF: predicated region fallthrough
CT: control target
= control target key end

     0   :  { %vm22_vm0 = vcmask 517120   ;;  %s262_s0 = inlined_call_operand.vmem [shape: f32[2,64], index: 0, kind: input, shape index: {}]   ;;  %s263_s1 = inlined_call_operand.vmem [shape: f32[1,64], index: 1, kind: input, shape index: {}]   ;;  %s264_s2 = inlined_call_operand.vmem [shape: f32[1,64], index: 2, kind: input, shape index: {}]   ;;  %s265_s3 = inlined_call_operand.vmem [shape: bf16[64,32], index: 3, kind: input, shape index: {}]   ;;  %s266_s4 = inlined_call_operand.hbm [shape: f32[2,32], index: 4, kind: output, shape index: {}]  }
   0x1   :  { %v19_v0 = vld [vmem:[%s262_s0] sm:$0x3] }
   0x2   :  { %v23_v1 = vsel %vm22_vm0, %v19_v0, 0.0 }
   0x3   :  { %24 = vadd.xlane.f32.xlu0 %v23_v1 }
   0x4   :  { %9 = vsyncpa [#allocation3], 0  ;;  %v171_v7 = vld [vmem:[%s265_s3] sm:$0xff]   ;;  %v201_v8 = vmov 0.0   ;;  %v172_v9 = vld [vmem:[%s265_s3 + $0x8] sm:$0xff]   ;;  %vm202_vm1 = vmmov 0  }
   0x5   :  { %156 = vmatprep.subr.bf16.mxu0 %v201_v8  ;;  %v173_v10 = vld [vmem:[%s265_s3 + $0x10] sm:$0xff]   ;;  %v174_v11 = vld [vmem:[%s265_s3 + $0x18] sm:$0xff]   ;;  %164 = vmatprep.mubr.msk.bf16.mxu0 %vm202_vm1, %v201_v8  ;;  %v144_v16 = vld [vmem:[%s263_s1] ss:$0 sm:$0xff]  ;;  %vm84_vm2 = vcmask 523264   ;;  %s203_s3 = smov [#allocation2]  }
   0x6   :  { %157 = vmatpush3.bf16.msra.mxu0 %v171_v7  ;;  %v145_v18 = vld [vmem:[%s264_s2] ss:$0 sm:$0xff]  ;;  %s136_s28 = sshll.u32 %s203_s3, 4  ;;  %vm128_vm3 = vcmask 254976   ;;  %s137_s28 = int_to_ptr.vmem [resolvable:$true] %s136_s28 }
   0x7   :  { %158 = vmatprep.subr.bf16.mxu0 %v201_v8  ;;  %s177_s29 = scalar_lea.vmem %s137_s28, 32  ;;  %p182_p1 = scmp.lt.s32.totalorder %s137_s28, %s137_s28 }
   0x8   :  { %p178_p0 = scmp.ne.s32.totalorder %s137_s28, %s177_s29  ;;  %p183_p2 = scmp.lt.s32.totalorder %s177_s29, %s177_s29 }
   0xa   :  { %159 = vmatpush3.bf16.msra.mxu0 %v172_v9  ;;  %p184_p3 = por %p183_p2, %p182_p1 }
   0xb   :  { %160 = vmatprep.subr.bf16.mxu0 %v201_v8 }
   0xc   :  { %p185_p4 = pnand %p184_p3, %p178_p0 }
   0xe   :  { %161 = vmatpush3.bf16.msra.mxu0 %v173_v10 }
   0xf   :  { %162 = vmatprep.subr.bf16.mxu0 %v201_v8 }
  0x12   :  { %163 = vmatpush3.bf16.msra.mxu0 %v174_v11 }
  0x90   :  { %v25_v2 = vpop.xlane.xlu0 %24 }
  0x91   :  { %v27_v3 = vmul.f32 0.015625, %v25_v2 }
  0x93   :  { %v28_v4 = vsub.f32 %v19_v0, %v27_v3 }
  0x95   :  { %v29_v5 = vmul.f32 %v28_v4, %v28_v4 }
  0x97   :  { %v30_v6 = vsel %vm22_vm0, %v29_v5, 0.0 }
  0x98   :  { %31 = vadd.xlane.f32.xlu0 %v30_v6 }
 0x125   :  { %v32_v12 = vpop.xlane.xlu0 %31 }
 0x126   :  { %v33_v13 = vmul.f32 0.015625, %v32_v12 }
 0x128   :  { %v34_v14 = vadd.f32 1e-05, %v33_v13 }
 0x12a   :  { %175 = vrsqrt.f32 %v34_v14 }
 0x134   :  { %v176_v15 = vpop.eup %175 }
 0x135   :  { %v36_v17 = vmul.f32 %v176_v15, %v28_v4 }
 0x137   :  { %v43_v19 = vmul.f32 %v144_v16, %v36_v17 }
 0x139   :  { %v50_v20 = vadd.f32 %v145_v18, %v43_v19 }
 0x13b   :  { %v51_v21 = vpack.c.bf16 %v50_v20, %v50_v20 }
 0x13d   :  { %165 = vmatmul.mubr.msk.bf16.vlgmr.msra.gmra.mrb[0].mxu0 %vm84_vm2, %v51_v21 }
 0x210   :  { %v122_v22 = vpop.f32.mrb[0].mxu0 }
 0x211   :  { %129 = vst.msk [vmem:[#allocation2] sm:$0x3] %vm128_vm3, %v122_v22  ;;  %v166_v23 = vpop.f32.mrb[1].mxu0 }
 0x212   :  { %v125_v24 = vpop.f32.mrb[2].mxu0 }
 0x213   :  { %188 = shalt.err (!%p185_p4)
}
 0x214   :  { %s189_s30 = scalar_lea.hbm %s266_s4, 32 }
 0x215   :  { %p190_p5 = scmp.ne.s32.totalorder %s266_s4, %s189_s30  ;;  %p193_p6 = scmp.lt.u32.totalorder %s189_s30, %s266_s4 }
 0x217   :  { %p195_p7 = pnand %p193_p6, %p190_p5 }
 0x219   :  { %198 = shalt.err (!%p195_p7)
}
 0x21a   :  { %139 = dma.vmem_to_hbm [thread:$0]  %s137_s28, 32, %s266_s4, [#allocation3]   ;;  %v167_v25 = vpop.f32.mrb[3].mxu0 }
 0x21b   :  { %199 = dma.done.wait [#allocation3], 32  }
 0x21c   :  { %200 = vsyncadd [#allocation3], 4294967264 }
 0x21d   :  { %143 = vsyncpa [#allocation3], 1 }

// kernel: vit_forward.4
= control target key start
LH: loop header
LB: loop body
LE: loop exit
PB: predicated region body
PF: predicated region fallthrough
CT: control target
= control target key end

     0   :  { %s634_s21 = smov 0   ;;  %s725_s0 = inlined_call_operand.vmem [shape: bf16[2,16,192], index: 0, kind: input, shape index: {}]   ;;  %s726_s1 = inlined_call_operand.vmem [shape: bf16[192,64], index: 1, kind: input, shape index: {}]   ;;  %s727_s2 = inlined_call_operand.vmem [shape: f32[1,64], index: 2, kind: input, shape index: {}]   ;;  %s728_s3 = inlined_call_operand.vmem [shape: f32[17,64], index: 3, kind: input, shape index: {}]   ;;  %s729_s4 = inlined_call_operand.vmem [shape: f32[1,64], index: 4, kind: input, shape index: {}]   ;;  %s730_s5 = inlined_call_operand.vmem [shape: f32[1,64], index: 5, kind: input, shape index: {}]   ;;  %s731_s6 = inlined_call_operand.vmem [shape: f32[2,24,64], index: 6, kind: output, shape index: {}]  }
   0x1 LB: > { %s531_s22 = sadd.s32 4294967295, %s595_s21   ;;  %p535_p0 = scmp.ge.s32.totalorder %s595_s21, 1  ;;  %s595_s21 = sphi %s634_s21, %s16_s21  }
   0x2   : > { %p212_p1 = scmp.lt.s32.totalorder %s595_s21, 3 }
   0x4   : > { %p213_p2 = pnand %p535_p0, %p212_p1 }
   0x5   : > { %v568_v0 = vld [vmem:[%s726_s1] sm:$0xff] (!%p213_p2)   ;;  %v597_v1 = vmov (!%p213_p2), 0   ;;  %p242_p3 = scmp.lt.s32.totalorder (!%p213_p2), %s531_s22, 1  ;;  %v569_v2 = vld [vmem:[%s726_s1 + $0x8] sm:$0xff] (!%p213_p2)   ;;  %v570_v3 = vld [vmem:[%s726_s1 + $0x10] sm:$0xff] (!%p213_p2)   ;;  %vm474_vm0 = vcmask (!%p213_p2), 522240   ;;  %v456_v56 = vlaneseq (!%p213_p2) }
   0x6   : > { %216 = sbr.rel (%p213_p2) target bundleno = 584 (0x248), region = 44  ;;  %388 = vmatprep.subr.bf16.mxu0 (!%p213_p2), %v597_v1  ;;  %v598_v4 = vmov (!%p213_p2), 0.0   ;;  %v571_v5 = vld [vmem:[%s726_s1 + $0x18] sm:$0xff] (!%p213_p2)   ;;  %vm384_vm1 = vcmask (!%p213_p2), 523264   ;;  %vm284_vm2 = vcmask (!%p213_p2), 516096   ;;  %v572_v9 = vld [vmem:[%s726_s1 + $0x20] sm:$0xff] (!%p213_p2)  }
   0x7   : > { %389 = vmatpush1.bf16.msra.mxu0 (!%p213_p2), %v568_v0  ;;  %v279_v7 = vld [vmem:[%s727_s2] sm:$0x1] (!%p213_p2)  ;;  %v573_v12 = vld [vmem:[%s726_s1 + $0x28] sm:$0xff] (!%p213_p2)   ;;  %v574_v13 = vld [vmem:[%s726_s1 + $0x30] sm:$0xff] (!%p213_p2)   ;;  %v457_v61 = vshrl.u32 (!%p213_p2), %v456_v56, 7 }
   0x8   : > { %390 = vmatprep.subr.bf16.mxu0 (!%p213_p2), %v597_v1  ;;  %v280_v8 = vld [vmem:[%s728_s3] sm:$0x1] (!%p213_p2)  ;;  %v575_v14 = vld [vmem:[%s726_s1 + $0x38] sm:$0xff] (!%p213_p2)   ;;  %v577_v16 = vld [vmem:[%s726_s1 + $0x48] sm:$0xff] (!%p213_p2)  }
   0x9   : > { %v281_v10 = vadd.f32 (!%p213_p2), %v280_v8, %v279_v7  ;;  %v576_v15 = vld [vmem:[%s726_s1 + $0x40] sm:$0xff] (!%p213_p2)   ;;  %v578_v17 = vld [vmem:[%s726_s1 + $0x50] sm:$0xff] (!%p213_p2)   ;;  %v579_v18 = vld [vmem:[%s726_s1 + $0x58] sm:$0xff] (!%p213_p2)   ;;  %v458_v62 = vsub.s32 (!%p213_p2), 0, %v457_v61 }
   0xa   : > { %v301_v22 = vld [vmem:[%s728_s3 + $0x1] sm:$0xff] (!%p213_p2)  ;;  %v302_v25 = vld [vmem:[%s728_s3 + $0x9] sm:$0xff] (!%p213_p2)  ;;  %v282_v49 = vld [vmem:[%s729_s4] sm:$0x1] (!%p213_p2) }
   0xb   : > { %391 = vmatpush1.bf16.msra.mxu0 (!%p213_p2), %v569_v2  ;;  %v285_v11 = vsel (!%p213_p2), %vm284_vm2, %v281_v10, 0.0  ;;  %v283_v51 = vld [vmem:[%s730_s5] sm:$0x1] (!%p213_p2)  ;;  %v459_v63 = vrot.slane (!%p213_p2), %v282_v49, %v458_v62 }
   0xc   : > { %392 = vmatprep.subr.bf16.mxu0 (!%p213_p2), %v597_v1  ;;  %286 = vadd.xlane.f32.xlu0 (!%p213_p2), %v285_v11 }
   0xd   : > { %s733_s22 = smov (!%p242_p3, %s531_s22), 1 }
   0xe   : > { %s557_s29 = smul.u32 24, %s733_s22  ;;  %s556_s30 = sshll.u32 %s733_s22, 4 }
   0xf   : > { %393 = vmatpush1.bf16.msra.mxu0 %v570_v3  ;;  %s663_s14 = scalar_lea.vmem %s725_s0, %s556_s30 }
  0x10   : > { %s654_s9 = scalar_lea.vmem %s731_s6, %s557_s29  ;;  %394 = vmatprep.subr.bf16.mxu0 %v597_v1  ;;  %v582_v6 = vld [vmem:[%s663_s14 + $0x4] ss:$8 sps:$4 sm:$0xff]   ;;  %v580_v19 = vld [vmem:[%s663_s14] ss:$8 sps:$4 sm:$0xff]  }
  0x11   : > { %475 = vst.msk [vmem:[%s654_s9 + $0x11] sm:$0x7f] %vm474_vm0, %v598_v4  ;;  %553 = vmatprep.mubr.msk.bf16.mxu0 %vm384_vm1, %v582_v6 }
  0x13   : > { %395 = vmatpush1.bf16.msra.mxu0 %v571_v5 }
  0x14   : > { %396 = vmatprep.subr.bf16.mxu0 %v597_v1 }
  0x17   : > { %397 = vmatpush1.bf16.msra.mxu0 %v572_v9 }
  0x18   : > { %398 = vmatprep.subr.bf16.mxu0 %v597_v1 }
  0x1b   : > { %399 = vmatpush1.bf16.msra.mxu0 %v573_v12 }
  0x1c   : > { %400 = vmatprep.subr.bf16.mxu0 %v597_v1 }
  0x1f   : > { %401 = vmatpush1.bf16.msra.mxu0 %v574_v13 }
  0x20   : > { %402 = vmatprep.subr.bf16.mxu0 %v597_v1 }
  0x23   : > { %403 = vmatpush1.bf16.msra.mxu0 %v575_v14 }
  0x24   : > { %404 = vmatprep.subr.bf16.mxu0 %v597_v1 }
  0x27   : > { %405 = vmatpush1.bf16.msra.mxu0 %v576_v15 }
  0x28   : > { %406 = vmatprep.subr.bf16.mxu0 %v597_v1 }
  0x2b   : > { %407 = vmatpush1.bf16.msra.mxu0 %v577_v16 }
  0x2c   : > { %408 = vmatprep.subr.bf16.mxu0 %v597_v1 }
  0x2f   : > { %409 = vmatpush1.bf16.msra.mxu0 %v578_v17 }
  0x30   : > { %410 = vmatprep.subr.bf16.mxu0 %v597_v1  ;;  %v467_v1 = vrot.slane %v283_v51, %v458_v62 }
  0x33   : > { %411 = vmatpush1.bf16.msra.mxu0 %v579_v18 }
  0x36   : > { %421 = vmatmul.mubr.bf16.vlgmr.msra.gmra.mrb[0].mxu0 %v580_v19 }
  0x99   : > { %v287_v20 = vpop.xlane.xlu0 %286 }
  0x9a   : > { %v289_v21 = vmul.f32 0.015625, %v287_v20 }
  0x9c   : > { %v290_v23 = vsub.f32 %v281_v10, %v289_v21 }
  0x9e   : > { %v291_v32 = vmul.f32 %v290_v23, %v290_v23 }
  0xa0   : > { %v292_v34 = vsel %vm284_vm2, %v291_v32, 0.0 }
 0x109   : > { %v422_v24 = vpop.f32.mrb[0].mxu0 }
 0x10a   : > { %v423_v26 = vadd.f32 %v422_v24, %v301_v22  ;;  %v424_v27 = vpop.f32.mrb[1].mxu0 }
 0x10b   : > { %v425_v28 = vpop.f32.mrb[2].mxu0 }
 0x10c   : > { %v426_v29 = vadd.f32 %v425_v28, %v302_v25  ;;  %v427_v30 = vpop.f32.mrb[3].mxu0  ;;  %v429_v31 = vsel %vm384_vm1, %v423_v26, 0.0 }
 0x10d   : > { %430 = vadd.xlane.f32.xlu0 %v429_v31 }
 0x10e   : > { %v432_v33 = vsel %vm384_vm1, %v426_v29, 0.0 }
 0x10f   : > { %433 = vadd.xlane.f32.xlu1 %v432_v33 }
 0x113   : > { %293 = vadd.xlane.f32.xlu1 %v292_v34 }
 0x19a   : > { %v431_v35 = vpop.xlane.xlu0 %430 }
 0x19b   : > { %v435_v36 = vmul.f32 0.015625, %v431_v35 }
 0x19c   : > { %v434_v37 = vpop.xlane.xlu1 %433 }
 0x19d   : > { %v437_v38 = vsub.f32 %v423_v26, %v435_v36  ;;  %v436_v39 = vmul.f32 0.015625, %v434_v37 }
 0x19f   : > { %v438_v40 = vsub.f32 %v426_v29, %v436_v39  ;;  %v439_v41 = vmul.f32 %v437_v38, %v437_v38 }
 0x1a0   : > { %v294_v42 = vpop.xlane.xlu1 %293 }
 0x1a1   : > { %v295_v43 = vmul.f32 0.015625, %v294_v42  ;;  %v441_v44 = vsel %vm384_vm1, %v439_v41, 0.0  ;;  %v440_v45 = vmul.f32 %v438_v40, %v438_v40 }
 0x1a2   : > { %442 = vadd.xlane.f32.xlu0 %v441_v44 }
 0x1a3   : > { %v296_v46 = vadd.f32 1e-05, %v295_v43  ;;  %v444_v47 = vsel %vm384_vm1, %v440_v45, 0.0 }
 0x1a4   : > { %445 = vadd.xlane.f32.xlu1 %v444_v47 }
 0x1a5   : > { %583 = vrsqrt.f32 %v296_v46 }
 0x1af   : > { %v584_v48 = vpop.eup %583 }
 0x1b0   : > { %v298_v50 = vmul.f32 %v584_v48, %v290_v23 }
 0x1b2   : > { %v299_v52 = vmul.f32 %v298_v50, %v282_v49 }
 0x1b4   : > { %v300_v53 = vadd.f32 %v299_v52, %v283_v51 }
 0x1b6   : > { %471 = vst.msk [vmem:[%s654_s9] sm:$0x1] %vm284_vm2, %v300_v53 }
 0x22f   : > { %v443_v54 = vpop.xlane.xlu0 %442 }
 0x230   : > { %v447_v55 = vmul.f32 0.015625, %v443_v54 }
 0x231   : > { %v446_v57 = vpop.xlane.xlu1 %445 }
 0x232   : > { %v449_v58 = vadd.f32 1e-05, %v447_v55  ;;  %v448_v59 = vmul.f32 0.015625, %v446_v57 }
 0x234   : > { %585 = vrsqrt.f32 %v449_v58  ;;  %v450_v60 = vadd.f32 1e-05, %v448_v59 }
 0x236   : > { %587 = vrsqrt.f32 %v450_v60 }
 0x23e   : > { %v586_v0 = vpop.eup %585 }
 0x23f   : > { %v453_v2 = vmul.f32 %v586_v0, %v437_v38 }
 0x240   : > { %v588_v3 = vpop.eup %587 }
 0x241   : > { %v461_v4 = vmul.f32 %v459_v63, %v453_v2  ;;  %v454_v5 = vmul.f32 %v588_v3, %v438_v40 }
 0x243   : > { %v469_v6 = vadd.f32 %v467_v1, %v461_v4  ;;  %v462_v7 = vmul.f32 %v459_v63, %v454_v5 }
 0x245   : > { %472 = vst.msk [vmem:[%s654_s9 + $0x1] sm:$0xff] %vm384_vm1, %v469_v6  ;;  %v470_v8 = vadd.f32 %v467_v1, %v462_v7 }
 0x247   : > { %473 = vst.msk [vmem:[%s654_s9 + $0x9] sm:$0xff] %vm384_vm1, %v470_v8 }
 0x248 PF: > { %s16_s21 = sadd.s32 1, %s595_s21  }
 0x249   : > { %p13_p4 = scmp.ge.s32.totalorder %s16_s21, 4  }
 0x24b   :  { %15 = sbr.rel (!%p13_p4) target bundleno = 1 (0x1), region = 74 }

// kernel: vit_forward.5
= control target key start
LH: loop header
LB: loop body
LE: loop exit
PB: predicated region body
PF: predicated region fallthrough
CT: control target
= control target key end

     0   :  { %s1942_s25 = smov 0   ;;  %s2227_s0 = inlined_call_operand.vmem [shape: f32[2,24,64], index: 0, kind: input, shape index: {}]   ;;  %s2228_s1 = inlined_call_operand.vmem [shape: f32[1,64], index: 1, kind: input, shape index: {}]   ;;  %s2229_s2 = inlined_call_operand.vmem [shape: f32[1,64], index: 2, kind: input, shape index: {}]   ;;  %s2230_s3 = inlined_call_operand.vmem [shape: bf16[64,192], index: 3, kind: input, shape index: {}]   ;;  %s2231_s4 = inlined_call_operand.vmem [shape: f32[1,192], index: 4, kind: input, shape index: {}]   ;;  %s2232_s5 = inlined_call_operand.vmem [shape: bf16[64,64], index: 5, kind: input, shape index: {}]   ;;  %s2233_s6 = inlined_call_operand.vmem [shape: f32[1,64], index: 6, kind: input, shape index: {}]   ;;  %s2234_s7 = inlined_call_operand.vmem [shape: f32[1,64], index: 7, kind: input, shape index: {}]   ;;  %s2235_s8 = inlined_call_operand.vmem [shape: f32[1,64], index: 8, kind: input, shape index: {}]   ;;  %s2236_s9 = inlined_call_operand.vmem [shape: bf16[64,256], index: 9, kind: input, shape index: {}]   ;;  %s2237_s10 = inlined_call_operand.vmem [shape: f32[1,256], index: 10, kind: input, shape index: {}]   ;;  %s2238_s11 = inlined_call_operand.vmem [shape: bf16[256,64], index: 11, kind: input, shape index: {}]   ;;  %s2239_s12 = inlined_call_operand.vmem [shape: f32[1,64], index: 12, kind: input, shape index: {}]   ;;  %s2240_s13 = inlined_call_operand.vmem [shape: f32[2,24,64], index: 13, kind: output, shape index: {}]  }
   0x1 LB: > { %s1572_s26 = sadd.s32 4294967295, %s1866_s25   ;;  %p1576_p0 = scmp.ge.s32.totalorder %s1866_s25, 1  ;;  %s1866_s25 = sphi %s1942_s25, %s23_s25  }
   0x2   : > { %p387_p1 = scmp.lt.s32.totalorder %s1866_s25, 3 }
   0x4   : > { %p388_p2 = pnand %p1576_p0, %p387_p1 }
   0x5   : > { %p431_p3 = scmp.lt.s32.totalorder (!%p388_p2), %s1572_s26, 1  ;;  %vm447_vm0 = vcmask (!%p388_p2), 523264   ;;  %v1756_v21 = vld [vmem:[%s2230_s3 + $0x4] ss:$8 sps:$4 sm:$0xff] (!%p388_p2)   ;;  %v1758_v22 = vld [vmem:[%s2230_s3] ss:$8 sps:$4 sm:$0xff] (!%p388_p2)   ;;  %v518_v55 = vlaneseq (!%p388_p2) }
   0x6   : > { %391 = sbr.rel (%p388_p2) target bundleno = 2598 (0xa26), region = 72  ;;  %574 = vmatprep.subr.bf16.mxu1 (!%p388_p2), %v1756_v21  ;;  %v1759_v23 = vld [vmem:[%s2230_s3 + $0x14] ss:$8 sps:$4 sm:$0xff] (!%p388_p2)   ;;  %v1761_v24 = vld [vmem:[%s2230_s3 + $0x10] ss:$8 sps:$4 sm:$0xff] (!%p388_p2)   ;;  %v1868_v29 = vmov (!%p388_p2), 0  }
   0x7   : > { %575 = vmatpush1.bf16.msra.mxu1 (!%p388_p2), %v1758_v22  ;;  %v1762_v25 = vld [vmem:[%s2230_s3 + $0x24] ss:$8 sps:$4 sm:$0xff] (!%p388_p2)   ;;  %v1764_v26 = vld [vmem:[%s2230_s3 + $0x20] ss:$8 sps:$4 sm:$0xff] (!%p388_p2)   ;;  %v1765_v27 = vld [vmem:[%s2230_s3 + $0x34] ss:$8 sps:$4 sm:$0xff] (!%p388_p2)   ;;  %606 = vmatprep.mubr.bf16.mxu1 (!%p388_p2), %v1868_v29 }
   0x8   : > { %576 = vmatprep.subr.bf16.mxu1 (!%p388_p2), %v1759_v23  ;;  %v1767_v28 = vld [vmem:[%s2230_s3 + $0x30] ss:$8 sps:$4 sm:$0xff] (!%p388_p2)   ;;  %v1579_v41 = vld [vmem:[%s2228_s1] ss:$0 sm:$0xff] (!%p388_p2)  ;;  %v2011_v56 = vshrl.u32 (!%p388_p2), %v518_v55, 7  ;;  %vm643_vm1 = vcmask (!%p388_p2), 261120  }
   0x9   : > { %v1580_v46 = vld [vmem:[%s2229_s2] ss:$0 sm:$0xff] (!%p388_p2)  ;;  %s1869_s22 = smov (!%p388_p2), 64   ;;  %s1870_s23 = smov (!%p388_p2), 96   ;;  %vm751_vm2 = vcmask (!%p388_p2), 1043456   ;;  %vm709_vm4 = vcmask (!%p388_p2), 195584  }
   0xa   : > { %v520_v57 = vsub.s32 (!%p388_p2), 0, %v2011_v56  ;;  %v516_v58 = vld [vmem:[%s2231_s4] sm:$0x3] (!%p388_p2)  ;;  %v524_v59 = vsub.s32 (!%p388_p2), 1, %v2011_v56  ;;  %s1871_s24 = smov (!%p388_p2), 32   ;;  %vm990_vm5 = vcmask (!%p388_p2), 523520  }
   0xb   : > { %577 = vmatpush1.bf16.msra.mxu1 (!%p388_p2), %v1761_v24 }
   0xc   : > { %578 = vmatprep.subr.bf16.mxu1 (!%p388_p2), %v1762_v25  ;;  %v521_v60 = vrot.slane (!%p388_p2), %v516_v58, %v520_v57  ;;  %v525_v62 = vrot.slane (!%p388_p2), %v516_v58, %v524_v59 }
   0xd   : > { %s2242_s26 = smov (!%p431_p3, %s1572_s26), 1 }
   0xe   : > { %s1743_s27 = smul.u32 24, %s2242_s26 }
   0xf   : > { %579 = vmatpush1.bf16.msra.mxu1 %v1764_v26 }
  0x10   : > { %s435_s30 = scalar_lea.vmem %s2227_s0, %s1743_s27  ;;  %580 = vmatprep.subr.bf16.mxu1 %v1765_v27 }
  0x11   : > { %v1958_v0 = vld [vmem:[%s435_s30] sm:$0xff]  ;;  %v1960_v1 = vld [vmem:[%s435_s30 + $0x10] sm:$0xff]  ;;  %v1962_v2 = vld [vmem:[%s435_s30 + $0x8] sm:$0xff] }
  0x12   : > { %v448_v3 = vsel %vm447_vm0, %v1958_v0, 0.0  ;;  %v454_v4 = vsel %vm447_vm0, %v1960_v1, 0.0  ;;  %v451_v5 = vsel %vm447_vm0, %v1962_v2, 0.0 }
  0x13   : > { %449 = vadd.xlane.f32.xlu0 %v448_v3  ;;  %455 = vadd.xlane.f32.xlu1 %v454_v4 }
  0x14   : > { %581 = vmatpush1.bf16.msra.mxu1 %v1767_v28 }
  0x17   : > { %452 = vadd.xlane.f32.xlu0 %v451_v5 }
  0xa0   : > { %v450_v6 = vpop.xlane.xlu0 %449  ;;  %v456_v7 = vpop.xlane.xlu1 %455 }
  0xa1   : > { %v458_v8 = vmul.f32 0.015625, %v450_v6  ;;  %v460_v9 = vmul.f32 0.015625, %v456_v7 }
  0xa3   : > { %v461_v10 = vsub.f32 %v1958_v0, %v458_v8  ;;  %v463_v11 = vsub.f32 %v1960_v1, %v460_v9 }
  0xa4   : > { %v453_v12 = vpop.xlane.xlu0 %452 }
  0xa5   : > { %v459_v13 = vmul.f32 0.015625, %v453_v12  ;;  %v464_v14 = vmul.f32 %v461_v10, %v461_v10  ;;  %v466_v15 = vmul.f32 %v463_v11, %v463_v11 }
  0xa7   : > { %v462_v16 = vsub.f32 %v1962_v2, %v459_v13  ;;  %v467_v17 = vsel %vm447_vm0, %v464_v14, 0.0  ;;  %v473_v18 = vsel %vm447_vm0, %v466_v15, 0.0 }
  0xa8   : > { %468 = vadd.xlane.f32.xlu1 %v467_v17 }
  0xa9   : > { %v465_v19 = vmul.f32 %v462_v16, %v462_v16 }
  0xab   : > { %v470_v20 = vsel %vm447_vm0, %v465_v19, 0.0 }
  0xac   : > { %474 = vadd.xlane.f32.xlu1 %v473_v18  ;;  %471 = vadd.xlane.f32.xlu0 %v470_v20 }
 0x135   : > { %v469_v30 = vpop.xlane.xlu1 %468 }
 0x136   : > { %v476_v31 = vmul.f32 0.015625, %v469_v30 }
 0x138   : > { %v479_v32 = vadd.f32 1e-05, %v476_v31 }
 0x139   : > { %v475_v33 = vpop.xlane.xlu1 %474  ;;  %v472_v34 = vpop.xlane.xlu0 %471 }
 0x13a   : > { %1800 = vrsqrt.f32 %v479_v32  ;;  %v478_v35 = vmul.f32 0.015625, %v475_v33  ;;  %v477_v36 = vmul.f32 0.015625, %v472_v34 }
 0x13c   : > { %v481_v37 = vadd.f32 1e-05, %v478_v35  ;;  %v480_v38 = vadd.f32 1e-05, %v477_v36  ;;  %v629_v36 = vand.u32 127, %v518_v55 }
 0x13e   : > { %1802 = vrsqrt.f32 %v481_v37  ;;  %vm630_vm3 = vcmp.lt.s32.totalorder %v629_v36, 17 }
 0x13f   : > { %1804 = vrsqrt.f32 %v480_v38 }
 0x144   : > { %v1801_v39 = vpop.eup %1800 }
 0x145   : > { %v485_v40 = vmul.f32 %v1801_v39, %v461_v10 }
 0x147   : > { %v494_v45 = vmul.f32 %v1579_v41, %v485_v40 }
 0x148   : > { %v1803_v42 = vpop.eup %1802 }
 0x149   : > { %v1805_v43 = vpop.eup %1804  ;;  %v487_v48 = vmul.f32 %v1803_v42, %v463_v11  ;;  %v503_v49 = vadd.f32 %v1580_v46, %v494_v45 }
 0x14a   : > { %v486_v44 = vmul.f32 %v1805_v43, %v462_v16 }
 0x14b   : > { %v496_v52 = vmul.f32 %v1579_v41, %v487_v48 }
 0x14c   : > { %v495_v47 = vmul.f32 %v1579_v41, %v486_v44 }
 0x14d   : > { %v505_v53 = vadd.f32 %v1580_v46, %v496_v52 }
 0x14e   : > { %v504_v50 = vadd.f32 %v1580_v46, %v495_v47 }
 0x14f   : > { %v507_v54 = vpack.c.bf16 %v505_v53, %v505_v53 }
 0x150   : > { %v506_v51 = vpack.c.bf16 %v504_v50, %v503_v49 }
 0x152   : > { %1589 = vmatmul.mubr.msk.bf16.vlgmr.msra.gmra.mrb[0].mxu1 %vm447_vm0, %v506_v51 }
 0x153   : > { %616 = vmatprep.mubr.bf16.mxu1 %v1868_v29 }
 0x15a   : > { %1590 = vmatmul.mubr.msk.bf16.gmra.mrb[4].mxu1 %vm447_vm0, %v507_v54 }
 0x225   : > { %v608_v61 = vpop.f32.mrb[0].mxu1 }
 0x226   : > { %v609_v63 = vadd.f32 %v608_v61, %v521_v60  ;;  %v610_v3 = vpop.f32.mrb[1].mxu1 }
 0x227   : > { %v612_v4 = vpop.f32.mrb[2].mxu1  ;;  %v611_v7 = vadd.f32 %v610_v3, %v525_v62 }
 0x228   : > { %v613_v5 = vadd.f32 %v612_v4, %v521_v60  ;;  %v614_v6 = vpop.f32.mrb[3].mxu1  ;;  %v625_v9 = vmul.f32 0.17677669, %v609_v63 }
 0x229   : > { %v615_v8 = vadd.f32 %v614_v6, %v525_v62 }
 0x22a   : > { %v626_v10 = vmul.f32 0.17677669, %v613_v5  ;;  %v633_v11 = vpack.c.bf16 %v613_v5, %v609_v63 }
 0x22b   : > { %v2022_v12 = vpack.c.bf16 %v615_v8, %v611_v7 }
 0x22c   : > { %v631_v13 = vpack.c.bf16 %v626_v10, %v625_v9  ;;  %639 = vrot.lane.b32.xlu0 %v633_v11, %s1869_s22 }
 0x22d   : > { %v618_v14 = vpop.f32.mrb[4].mxu1 }
 0x22e   : > { %v619_v15 = vadd.f32 %v618_v14, %v521_v60  ;;  %v620_v16 = vpop.f32.mrb[5].mxu1  ;;  %1697 = vmatprep.mubr.msk.bf16.mxu1 %vm643_vm1, %v631_v13 }
 0x22f   : > { %v622_v17 = vpop.f32.mrb[6].mxu1  ;;  %v621_v30 = vadd.f32 %v620_v16, %v525_v62 }
 0x230   : > { %v634_v18 = vpack.c.bf16 %v619_v15, %v619_v15  ;;  %v623_v19 = vpop.f32.mrb[7].mxu1  ;;  %808 = vrot.lane.b32.xlu0 %v631_v13, %s1870_s23  ;;  %v627_v20 = vmul.f32 0.17677669, %v619_v15 }
 0x231   : > { %v2038_v32 = vpack.c.bf16 %v621_v30, %v621_v30 }
 0x232   : > { %641 = vrot.lane.b32.xlu1 %v634_v18, %s1869_s22  ;;  %v632_v21 = vpack.c.bf16 %v627_v20, %v627_v20 }
 0x233   : > { %v753_v34 = vsel %vm751_vm2, %v2038_v32, 0 }
 0x236   : > { %812 = vrot.lane.b32.xlu1 %v633_v11, %s1871_s24 }
 0x23a   : > { %814 = vrot.lane.b32.xlu1 %v634_v18, %s1871_s24 }
 0x23e   : > { %810 = vrot.lane.b32.xlu1 %v632_v21, %s1870_s23 }
 0x29e   : > { %v640_v22 = vpop.permute.xlu0 %639 }
 0x29f   : > { %v651_v23 = vsel %vm643_vm1, %v640_v22, 0  ;;  %1737 = vmatprep.subr.msk.bf16.mxu1 %vm643_vm1, %v640_v22 }
 0x2a0   : > { %1694 = vmatpush3.bf16.xpose.msra.mxu1 %v651_v23 }
 0x2a2   : > { %v809_v24 = vpop.permute.xlu0 %808 }
 0x2a3   : > { %1713 = vmatprep.mubr.msk.bf16.mxu0 %vm643_vm1, %v809_v24 }
 0x2a4   : > { %v642_v25 = vpop.permute.xlu1 %641 }
 0x2a5   : > { %1738 = vmatprep.subr.msk.bf16.mxu1 %vm643_vm1, %v642_v25  ;;  %v654_v26 = vsel %vm643_vm1, %v642_v25, 0 }
 0x2a8   : > { %v813_v27 = vpop.permute.xlu1 %812  ;;  %1696 = vmatpush3.bf16.xpose.msra.mxu1 %v654_v26 }
 0x2a9   : > { %1701 = vmatprep.subr.bf16.mxu1 %v2022_v12  ;;  %1740 = vmatprep.subr.msk.bf16.mxu0 %vm643_vm1, %v813_v27  ;;  %v823_v28 = vsel %vm643_vm1, %v813_v27, 0 }
 0x2aa   : > { %1710 = vmatpush3.bf16.xpose.msra.mxu0 %v823_v28 }
 0x2ac   : > { %v815_v31 = vpop.permute.xlu1 %814 }
 0x2ad   : > { %1741 = vmatprep.subr.msk.bf16.mxu0 %vm643_vm1, %v815_v31  ;;  %v826_v33 = vsel %vm643_vm1, %v815_v31, 0 }
 0x2af   : > { %1698 = vmatmul.mubr.msk.bf16.vlgmr.msra.gmra.mrb[8].mxu1 %vm643_vm1, %v632_v21 }
 0x2b0   : > { %1702 = vmatpush3.bf16.msra.mxu1 %v2022_v12  ;;  %v811_v35 = vpop.permute.xlu1 %810 }
 0x2b1   : > { %1739 = vmatprep.subr.msk.bf16.mxu1 %vm751_vm2, %v2038_v32 }
 0x2b2   : > { %1712 = vmatpush3.bf16.xpose.msra.mxu0 %v826_v33 }
 0x2b4   : > { %1704 = vmatpush3.bf16.msra.mxu1 %v753_v34 }
 0x2b9   : > { %1714 = vmatmul.mubr.msk.bf16.vlgmr.msra.gmra.mrb[0].mxu0 %vm643_vm1, %v811_v35 }
 0x382   : > { %v1699_v37 = vpop.f32.mrb[8].mxu1 }
 0x383   : > { %v690_v38 = vpop.f32.mrb[9].mxu1  ;;  %v708_v43 = vsel %vm630_vm3, %v1699_v37, -1e+30 }
 0x384   : > { %v706_v39 = vsel %vm630_vm3, %v690_v38, -1e+30  ;;  %v1700_v40 = vpop.f32.mrb[10].mxu1  ;;  %v716_v46 = vsel %vm709_vm4, %v708_v43, -inf }
 0x385   : > { %v693_v41 = vpop.f32.mrb[11].mxu1  ;;  %v710_v42 = vsel %vm709_vm4, %v706_v39, -inf }
 0x386   : > { %v707_v44 = vsel %vm630_vm3, %v693_v41, -1e+30  ;;  %711 = vmax.xlane.f32.xlu0 %v710_v42 }
 0x387   : > { %v713_v45 = vsel %vm709_vm4, %v707_v44, -inf }
 0x388   : > { %714 = vmax.xlane.f32.xlu1 %v713_v45 }
 0x38a   : > { %717 = vmax.xlane.f32.xlu0 %v716_v46 }
 0x38c   : > { %v1715_v47 = vpop.f32.mrb[0].mxu0 }
 0x38d   : > { %v878_v48 = vsel %vm630_vm3, %v1715_v47, -1e+30  ;;  %v862_v49 = vpop.f32.mrb[1].mxu0 }
 0x38e   : > { %v876_v50 = vsel %vm630_vm3, %v862_v49, -1e+30  ;;  %v1716_v51 = vpop.f32.mrb[2].mxu0  ;;  %v885_v52 = vsel %vm709_vm4, %v878_v48, -inf }
 0x38f   : > { %v865_v53 = vpop.f32.mrb[3].mxu0  ;;  %886 = vmax.xlane.f32.xlu1 %v885_v52  ;;  %v879_v54 = vsel %vm709_vm4, %v876_v50, -inf }
 0x390   : > { %v877_v55 = vsel %vm630_vm3, %v865_v53, -1e+30  ;;  %880 = vmax.xlane.f32.xlu0 %v879_v54 }
 0x391   : > { %v882_v58 = vsel %vm709_vm4, %v877_v55, -inf }
 0x394   : > { %883 = vmax.xlane.f32.xlu0 %v882_v58  ;;  %v1769_v58 = vld [vmem:[%s2232_s5 + $0x8] sm:$0xff]  }
 0x413   : > { %v712_v60 = vpop.xlane.xlu0 %711 }
 0x414   : > { %v719_v61 = vsub.f32 %v706_v39, %v712_v60 }
 0x415   : > { %v715_v63 = vpop.xlane.xlu1 %714 }
 0x416   : > { %v722_v4 = vmul.f32 1.442695, %v719_v61  ;;  %v720_v10 = vsub.f32 %v707_v44, %v715_v63 }
 0x417   : > { %v718_v62 = vpop.xlane.xlu0 %717 }
 0x418   : > { %v721_v3 = vsub.f32 %v708_v43, %v718_v62  ;;  %v724_v16 = vmul.f32 1.442695, %v720_v10  ;;  %v1770_v62 = vld [vmem:[%s2232_s5 + $0x10] sm:$0xff]  }
 0x41a   : > { %v726_v5 = vmul.f32 1.442695, %v721_v3 }
 0x41c   : > { %1806 = vpow2.f32 %v726_v5  ;;  %v887_v6 = vpop.xlane.xlu1 %886 }
 0x41d   : > { %v890_v7 = vsub.f32 %v878_v48, %v887_v6  ;;  %v881_v8 = vpop.xlane.xlu0 %880  ;;  %1808 = vpow2.f32 %v722_v4  ;;  %v1771_v4 = vld [vmem:[%s2232_s5 + $0x18] sm:$0xff]  }
 0x41e   : > { %v888_v9 = vsub.f32 %v876_v50, %v881_v8 }
 0x41f   : > { %v895_v11 = vmul.f32 1.442695, %v890_v7 }
 0x420   : > { %v891_v13 = vmul.f32 1.442695, %v888_v9 }
 0x421   : > { %1810 = vpow2.f32 %v895_v11  ;;  %v884_v14 = vpop.xlane.xlu0 %883 }
 0x422   : > { %v889_v15 = vsub.f32 %v877_v55, %v884_v14  ;;  %1812 = vpow2.f32 %v891_v13  ;;  %v1768_v55 = vld [vmem:[%s2232_s5] sm:$0xff]  }
 0x423   : > { %1725 = vmatprep.subr.bf16.mxu0 %v1768_v55 }
 0x424   : > { %v893_v17 = vmul.f32 1.442695, %v889_v15  ;;  %1726 = vmatpush3.bf16.msra.mxu0 %v1768_v55 }
 0x425   : > { %1727 = vmatprep.subr.bf16.mxu0 %v1769_v58 }
 0x426   : > { %v1807_v18 = vpop.eup %1806  ;;  %1814 = vpow2.f32 %v893_v17 }
 0x427   : > { %1816 = vpow2.f32 %v724_v16  ;;  %v734_v19 = vsel %vm709_vm4, %v1807_v18, 0.0  ;;  %v1809_v20 = vpop.eup %1808 }
 0x428   : > { %735 = vadd.xlane.f32.xlu0 %v734_v19  ;;  %v728_v22 = vsel %vm709_vm4, %v1809_v20, 0.0  ;;  %1728 = vmatpush3.bf16.msra.mxu0 %v1769_v58  ;;  %v1605_v19 = vld [vmem:[%s2233_s6] ss:$0 sm:$0xff] }
 0x429   : > { %1729 = vmatprep.subr.bf16.mxu0 %v1770_v62 }
 0x42b   : > { %v1811_v21 = vpop.eup %1810 }
 0x42c   : > { %729 = vadd.xlane.f32.xlu0 %v728_v22  ;;  %v903_v23 = vsel %vm709_vm4, %v1811_v21, 0.0  ;;  %v1813_v24 = vpop.eup %1812  ;;  %1730 = vmatpush3.bf16.msra.mxu0 %v1770_v62 }
 0x42d   : > { %904 = vadd.xlane.f32.xlu1 %v903_v23  ;;  %v897_v26 = vsel %vm709_vm4, %v1813_v24, 0.0  ;;  %1731 = vmatprep.subr.bf16.mxu0 %v1771_v4 }
 0x430   : > { %v1815_v25 = vpop.eup %1814  ;;  %1732 = vmatpush3.bf16.msra.mxu0 %v1771_v4  ;;  %v1606_v4 = vld [vmem:[%s2234_s7] ss:$0 sm:$0xff] }
 0x431   : > { %v1817_v27 = vpop.eup %1816  ;;  %898 = vadd.xlane.f32.xlu1 %v897_v26  ;;  %v900_v28 = vsel %vm709_vm4, %v1815_v25, 0.0 }
 0x432   : > { %901 = vadd.xlane.f32.xlu0 %v900_v28  ;;  %v731_v30 = vsel %vm709_vm4, %v1817_v27, 0.0 }
 0x435   : > { %732 = vadd.xlane.f32.xlu1 %v731_v30 }
 0x446   : > { %918 = vrot.lane.b32.xlu1 %v2038_v32, %s1870_s23 }
 0x448   : > { %916 = vrot.lane.b32.xlu0 %v2022_v12, %s1870_s23  ;;  %s440_s23 = scalar_lea.vmem %s2240_s13, %s1743_s27 }
 0x4b5   : > { %v736_v31 = vpop.xlane.xlu0 %735 }
 0x4b6   : > { %1818 = vrcp.f32 %v736_v31 }
 0x4b9   : > { %v730_v34 = vpop.xlane.xlu0 %729 }
 0x4ba   : > { %v905_v33 = vpop.xlane.xlu1 %904  ;;  %1820 = vrcp.f32 %v730_v34 }
 0x4be   : > { %v899_v35 = vpop.xlane.xlu1 %898 }
 0x4bf   : > { %v902_v36 = vpop.xlane.xlu0 %901  ;;  %1822 = vrcp.f32 %v899_v35 }
 0x4c0   : > { %1824 = vrcp.f32 %v902_v36  ;;  %v1819_v39 = vpop.eup %1818 }
 0x4c1   : > { %v742_v12 = vmul.f32 %v1819_v39, %v1807_v18 }
 0x4c2   : > { %v733_v37 = vpop.xlane.xlu1 %732 }
 0x4c3   : > { %1826 = vrcp.f32 %v733_v37  ;;  %v917_v38 = vpop.permute.xlu0 %916  ;;  %v744_v48 = vpack.c.bf16 %v742_v12, %v742_v12 }
 0x4c4   : > { %1717 = vmatprep.subr.bf16.mxu1 %v917_v38  ;;  %1828 = vrcp.f32 %v905_v33  ;;  %v1821_v40 = vpop.eup %1820 }
 0x4c5   : > { %v740_v43 = vmul.f32 %v1821_v40, %v1809_v20 }
 0x4c6   : > { %v919_v51 = vpop.permute.xlu1 %918 }
 0x4c7   : > { %v928_v53 = vsel %vm751_vm2, %v919_v51, 0 }
 0x4c9   : > { %v1823_v32 = vpop.eup %1822 }
 0x4ca   : > { %v1825_v41 = vpop.eup %1824  ;;  %v909_v45 = vmul.f32 %v1823_v32, %v1813_v24 }
 0x4cb   : > { %v910_v46 = vmul.f32 %v1825_v41, %v1815_v25 }
 0x4cd   : > { %v1827_v42 = vpop.eup %1826  ;;  %v912_v50 = vpack.c.bf16 %v910_v46, %v909_v45  ;;  %v1772_v45 = vld [vmem:[%s2236_s9] ss:$8 sps:$4 sm:$0xff]   ;;  %v1777_v46 = vld [vmem:[%s2236_s9 + $0x14] ss:$8 sps:$4 sm:$0xff]  }
 0x4ce   : > { %v741_v44 = vmul.f32 %v1827_v42, %v1817_v27  ;;  %v1829_v49 = vpop.eup %1828 }
 0x4cf   : > { %v911_v52 = vmul.f32 %v1829_v49, %v1811_v21  ;;  %v1778_v49 = vld [vmem:[%s2236_s9 + $0x20] ss:$8 sps:$4 sm:$0xff]  }
 0x4d0   : > { %v743_v47 = vpack.c.bf16 %v741_v44, %v740_v43  ;;  %v1774_v44 = vld [vmem:[%s2236_s9 + $0x4] ss:$8 sps:$4 sm:$0xff]  }
 0x4d1   : > { %v913_v54 = vpack.c.bf16 %v911_v52, %v911_v52 }
 0x4d2   : > { %1705 = vmatprep.mubr.msk.bf16.mxu1 %vm709_vm4, %v743_v47  ;;  %v1775_v47 = vld [vmem:[%s2236_s9 + $0x10] ss:$8 sps:$4 sm:$0xff]  }
 0x4d3   : > { %1706 = vmatmul.mubr.msk.bf16.vlgmr.msra.gmra.mrb[12].mxu1 %vm709_vm4, %v744_v48  ;;  %v1780_v48 = vld [vmem:[%s2236_s9 + $0x24] ss:$8 sps:$4 sm:$0xff]  }
 0x4d4   : > { %1718 = vmatpush3.bf16.msra.mxu1 %v917_v38  ;;  %1721 = vmatprep.mubr.msk.bf16.mxu1 %vm709_vm4, %v912_v50  ;;  %v1783_v50 = vld [vmem:[%s2236_s9 + $0x34] ss:$8 sps:$4 sm:$0xff]  }
 0x4d5   : > { %1742 = vmatprep.subr.msk.bf16.mxu1 %vm751_vm2, %v919_v51  ;;  %v1781_v51 = vld [vmem:[%s2236_s9 + $0x30] ss:$8 sps:$4 sm:$0xff]  }
 0x4d8   : > { %1720 = vmatpush3.bf16.msra.mxu1 %v928_v53 }
 0x4d9   : > { %1225 = vmatprep.subr.bf16.mxu1 %v1774_v44 }
 0x4db   : > { %1722 = vmatmul.mubr.msk.bf16.vlgmr.msra.gmra.mrb[16].mxu1 %vm709_vm4, %v913_v54 }
 0x4dc   : > { %1257 = vmatprep.mubr.bf16.mxu1 %v1868_v29  ;;  %1226 = vmatpush1.bf16.msra.mxu1 %v1772_v45 }
 0x4dd   : > { %1227 = vmatprep.subr.bf16.mxu1 %v1777_v46 }
 0x4e0   : > { %1228 = vmatpush1.bf16.msra.mxu1 %v1775_v47 }
 0x4e1   : > { %1229 = vmatprep.subr.bf16.mxu1 %v1780_v48 }
 0x4e4   : > { %1230 = vmatpush1.bf16.msra.mxu1 %v1778_v49 }
 0x4e5   : > { %1231 = vmatprep.subr.bf16.mxu1 %v1783_v50 }
 0x4e8   : > { %1232 = vmatpush1.bf16.msra.mxu1 %v1781_v51 }
 0x5a6   : > { %v1707_v60 = vpop.f32.mrb[12].mxu1 }
 0x5a7   : > { %805 = vst.msk [vmem:[#allocation2 + $0x10] sm:$0xff] %vm643_vm1, %v1707_v60  ;;  %v789_v61 = vpop.f32.mrb[13].mxu1 }
 0x5a8   : > { %803 = vst.msk [vmem:[#allocation2] sm:$0xff] %vm643_vm1, %v789_v61  ;;  %v1708_v63 = vpop.f32.mrb[14].mxu1 }
 0x5a9   : > { %v792_v3 = vpop.f32.mrb[15].mxu1 }
 0x5aa   : > { %804 = vst.msk [vmem:[#allocation2 + $0x8] sm:$0xff] %vm643_vm1, %v792_v3 }
 0x5ae   : > { %v1723_v5 = vpop.f32.mrb[16].mxu1 }
 0x5af   : > { %985 = vrot.lane.b32.xlu0 %v1723_v5, %s1871_s24  ;;  %v964_v6 = vpop.f32.mrb[17].mxu1 }
 0x5b0   : > { %981 = vrot.lane.b32.xlu1 %v964_v6, %s1871_s24  ;;  %v1724_v7 = vpop.f32.mrb[18].mxu1 }
 0x5b1   : > { %v967_v8 = vpop.f32.mrb[19].mxu1 }
 0x5b4   : > { %983 = vrot.lane.b32.xlu1 %v967_v8, %s1871_s24 }
 0x621   : > { %v986_v9 = vpop.permute.xlu0 %985 }
 0x622   : > { %993 = vst.msk [vmem:[#allocation2 + $0x10] sm:$0xff] %vm990_vm5, %v986_v9  ;;  %v982_v10 = vpop.permute.xlu1 %981  ;;  %v1607_v9 = vld [vmem:[%s2235_s8] ss:$0 sm:$0xff] }
 0x623   : > { %991 = vst.msk [vmem:[#allocation2] sm:$0xff] %vm990_vm5, %v982_v10 }
 0x626   : > { %v984_v11 = vpop.permute.xlu1 %983 }
 0x627   : > { %992 = vst.msk [vmem:[#allocation2 + $0x8] sm:$0xff] %vm990_vm5, %v984_v11 }
 0x629   : > { %v996_v13 = vld [vmem:[#allocation2 + $0x10] sm:$0xff] }
 0x62a   : > { %v994_v14 = vld [vmem:[#allocation2] sm:$0xff]  ;;  %v998_v17 = vpack.c.bf16 %v996_v13, %v996_v13 }
 0x62e   : > { %v995_v15 = vld [vmem:[#allocation2 + $0x8] sm:$0xff] }
 0x62f   : > { %v997_v16 = vpack.c.bf16 %v995_v15, %v994_v14 }
 0x631   : > { %1733 = vmatprep.mubr.msk.bf16.mxu0 %vm447_vm0, %v997_v16 }
 0x632   : > { %1734 = vmatmul.mubr.msk.bf16.vlgmr.msra.gmra.mrb[4].mxu0 %vm447_vm0, %v998_v17 }
 0x705   : > { %v1735_v18 = vpop.f32.mrb[4].mxu0 }
 0x706   : > { %v1071_v20 = vpop.f32.mrb[5].mxu0  ;;  %v1087_v24 = vadd.f32 %v1735_v18, %v1960_v1 }
 0x707   : > { %v1085_v21 = vadd.f32 %v1071_v20, %v1958_v0  ;;  %v1736_v22 = vpop.f32.mrb[6].mxu0  ;;  %v1784_v20 = vld [vmem:[%s2238_s11 + $0x40] sm:$0xff]  }
 0x708   : > { %v1074_v23 = vpop.f32.mrb[7].mxu0  ;;  %v2110_v30 = vadd.f32 %v1605_v19, %v1087_v24  ;;  %1665 = vmatprep.subr.bf16.mxu0 %v1784_v20  ;;  %v1786_v22 = vld [vmem:[%s2238_s11 + $0x48] sm:$0xff]   ;;  %v1789_v24 = vld [vmem:[%s2238_s11 + $0x10] sm:$0xff]  }
 0x709   : > { %v2103_v25 = vadd.f32 %v1605_v19, %v1085_v21  ;;  %v1086_v26 = vadd.f32 %v1074_v23, %v1962_v2  ;;  %v1785_v21 = vld [vmem:[%s2238_s11] sm:$0xff]   ;;  %v1788_v23 = vld [vmem:[%s2238_s11 + $0x50] sm:$0xff]  }
 0x70a   : > { %v1106_v0 = vsel %vm447_vm0, %v2110_v30, 0.0  ;;  %1666 = vmatpush3.bf16.msra.mxu0 %v1785_v21 }
 0x70b   : > { %v2106_v27 = vadd.f32 %v1605_v19, %v1086_v26  ;;  %v1100_v28 = vsel %vm447_vm0, %v2103_v25, 0.0  ;;  %1667 = vmatprep.subr.bf16.mxu0 %v1786_v22  ;;  %v1790_v26 = vld [vmem:[%s2238_s11 + $0x58] sm:$0xff]  }
 0x70c   : > { %1101 = vadd.xlane.f32.xlu1 %v1100_v28  ;;  %v1791_v28 = vld [vmem:[%s2238_s11 + $0x18] sm:$0xff]  }
 0x70d   : > { %v1103_v31 = vsel %vm447_vm0, %v2106_v27, 0.0 }
 0x70e   : > { %1104 = vadd.xlane.f32.xlu0 %v1103_v31  ;;  %v1792_v31 = vld [vmem:[%s2238_s11 + $0x60] sm:$0xff]  }
 0x712   : > { %1107 = vadd.xlane.f32.xlu0 %v1106_v0  ;;  %v1793_v0 = vld [vmem:[%s2238_s11 + $0x20] sm:$0xff]  }
 0x799   : > { %v1102_v1 = vpop.xlane.xlu1 %1101 }
 0x79a   : > { %v1109_v33 = vmul.f32 0.015625, %v1102_v1  ;;  %v1794_v1 = vld [vmem:[%s2238_s11 + $0x68] sm:$0xff]  }
 0x79b   : > { %v1105_v34 = vpop.xlane.xlu0 %1104 }
 0x79c   : > { %v1112_v2 = vsub.f32 %v2103_v25, %v1109_v33  ;;  %v1110_v35 = vmul.f32 0.015625, %v1105_v34  ;;  %v1795_v33 = vld [vmem:[%s2238_s11 + $0x28] sm:$0xff]   ;;  %v1796_v34 = vld [vmem:[%s2238_s11 + $0x70] sm:$0xff]  }
 0x79e   : > { %v1113_v36 = vsub.f32 %v2106_v27, %v1110_v35  ;;  %v1115_v37 = vmul.f32 %v1112_v2, %v1112_v2  ;;  %v1798_v35 = vld [vmem:[%s2238_s11 + $0x78] sm:$0xff]  }
 0x79f   : > { %v1108_v38 = vpop.xlane.xlu0 %1107 }
 0x7a0   : > { %v1111_v39 = vmul.f32 0.015625, %v1108_v38  ;;  %v1118_v40 = vsel %vm447_vm0, %v1115_v37, 0.0  ;;  %v1116_v32 = vmul.f32 %v1113_v36, %v1113_v36  ;;  %v1167_v37 = vld [vmem:[%s2237_s10] sm:$0x3] }
 0x7a1   : > { %1119 = vadd.xlane.f32.xlu0 %v1118_v40  ;;  %v1172_v38 = vrot.slane %v1167_v37, %v520_v57 }
 0x7a2   : > { %v1114_v41 = vsub.f32 %v2110_v30, %v1111_v39  ;;  %v1121_v42 = vsel %vm447_vm0, %v1116_v32, 0.0  ;;  %v1176_v39 = vrot.slane %v1167_v37, %v524_v59 }
 0x7a3   : > { %1122 = vadd.xlane.f32.xlu1 %v1121_v42 }
 0x7a4   : > { %v1117_v12 = vmul.f32 %v1114_v41, %v1114_v41 }
 0x7a6   : > { %v1124_v43 = vsel %vm447_vm0, %v1117_v12, 0.0 }
 0x7a7   : > { %1125 = vadd.xlane.f32.xlu0 %v1124_v43 }
 0x82e   : > { %v1120_v52 = vpop.xlane.xlu0 %1119 }
 0x82f   : > { %v1127_v53 = vmul.f32 0.015625, %v1120_v52 }
 0x830   : > { %v1123_v54 = vpop.xlane.xlu1 %1122 }
 0x831   : > { %v1130_v55 = vadd.f32 1e-05, %v1127_v53  ;;  %v1128_v58 = vmul.f32 0.015625, %v1123_v54 }
 0x833   : > { %1830 = vrsqrt.f32 %v1130_v55  ;;  %v1131_v60 = vadd.f32 1e-05, %v1128_v58 }
 0x834   : > { %v1126_v61 = vpop.xlane.xlu0 %1125 }
 0x835   : > { %1832 = vrsqrt.f32 %v1131_v60  ;;  %v1129_v62 = vmul.f32 0.015625, %v1126_v61 }
 0x837   : > { %v1132_v63 = vadd.f32 1e-05, %v1129_v62 }
 0x839   : > { %1834 = vrsqrt.f32 %v1132_v63 }
 0x83d   : > { %v1831_v3 = vpop.eup %1830 }
 0x83e   : > { %v1136_v5 = vmul.f32 %v1831_v3, %v1112_v2  ;;  %v1797_v2 = vld [vmem:[%s2238_s11 + $0x30] sm:$0xff]  }
 0x83f   : > { %v1833_v6 = vpop.eup %1832 }
 0x840   : > { %v1145_v7 = vmul.f32 %v1606_v4, %v1136_v5  ;;  %v1137_v8 = vmul.f32 %v1833_v6, %v1113_v36  ;;  %v1799_v36 = vld [vmem:[%s2238_s11 + $0x38] sm:$0xff]  }
 0x842   : > { %v1146_v10 = vmul.f32 %v1606_v4, %v1137_v8  ;;  %v1154_v14 = vadd.f32 %v1607_v9, %v1145_v7 }
 0x843   : > { %v1835_v11 = vpop.eup %1834 }
 0x844   : > { %v1138_v13 = vmul.f32 %v1835_v11, %v1114_v41  ;;  %v1155_v15 = vadd.f32 %v1607_v9, %v1146_v10 }
 0x846   : > { %v1157_v16 = vpack.c.bf16 %v1155_v15, %v1154_v14  ;;  %v1147_v17 = vmul.f32 %v1606_v4, %v1138_v13 }
 0x848   : > { %1616 = vmatmul.mubr.msk.bf16.vlgmr.msra.gmra.mrb[20].mxu1 %vm447_vm0, %v1157_v16  ;;  %v1156_v18 = vadd.f32 %v1607_v9, %v1147_v17 }
 0x849   : > { %1267 = vmatprep.mubr.bf16.mxu1 %v1868_v29  ;;  %v1787_v29 = vld [vmem:[%s2238_s11 + $0x8] sm:$0xff]  }
 0x84a   : > { %v1158_v19 = vpack.c.bf16 %v1156_v18, %v1156_v18  ;;  %1668 = vmatpush3.bf16.msra.mxu0 %v1787_v29 }
 0x84b   : > { %1669 = vmatprep.subr.bf16.mxu0 %v1788_v23 }
 0x84e   : > { %1670 = vmatpush3.bf16.msra.mxu0 %v1789_v24 }
 0x84f   : > { %1671 = vmatprep.subr.bf16.mxu0 %v1790_v26 }
 0x850   : > { %1617 = vmatmul.mubr.msk.bf16.gmra.mrb[24].mxu1 %vm447_vm0, %v1158_v19 }
 0x852   : > { %1672 = vmatpush3.bf16.msra.mxu0 %v1791_v28 }
 0x853   : > { %1673 = vmatprep.subr.bf16.mxu0 %v1792_v31 }
 0x856   : > { %1674 = vmatpush3.bf16.msra.mxu0 %v1793_v0 }
 0x857   : > { %1675 = vmatprep.subr.bf16.mxu0 %v1794_v1 }
 0x85a   : > { %1676 = vmatpush3.bf16.msra.mxu0 %v1795_v33 }
 0x85b   : > { %1677 = vmatprep.subr.bf16.mxu0 %v1796_v34 }
 0x85e   : > { %1678 = vmatpush3.bf16.msra.mxu0 %v1797_v2  ;;  %v1624_v2 = vld [vmem:[%s2239_s12] ss:$0 sm:$0xff] }
 0x85f   : > { %1679 = vmatprep.subr.bf16.mxu0 %v1798_v35 }
 0x862   : > { %1680 = vmatpush3.bf16.msra.mxu0 %v1799_v36 }
 0x91b   : > { %v1259_v40 = vpop.f32.mrb[20].mxu1 }
 0x91c   : > { %v1260_v32 = vadd.f32 %v1259_v40, %v1172_v38  ;;  %v1261_v41 = vpop.f32.mrb[21].mxu1 }
 0x91d   : > { %v1262_v42 = vadd.f32 %v1261_v41, %v1176_v39  ;;  %v1263_v12 = vpop.f32.mrb[22].mxu1 }
 0x91e   : > { %v1618_v43 = vmul.f32 -1.702, %v1260_v32  ;;  %v1264_v44 = vadd.f32 %v1263_v12, %v1172_v38  ;;  %v1265_v45 = vpop.f32.mrb[23].mxu1 }
 0x91f   : > { %v1619_v46 = vmul.f32 -1.702, %v1262_v42  ;;  %v1266_v47 = vadd.f32 %v1265_v45, %v1176_v39 }
 0x920   : > { %v1288_v48 = vmul.f32 1.442695, %v1618_v43  ;;  %v1620_v49 = vmul.f32 -1.702, %v1264_v44 }
 0x921   : > { %v1290_v50 = vmul.f32 1.442695, %v1619_v46  ;;  %v1621_v51 = vmul.f32 -1.702, %v1266_v47 }
 0x922   : > { %1836 = vpow2.f32 %v1288_v48  ;;  %v1292_v52 = vmul.f32 1.442695, %v1620_v49 }
 0x923   : > { %1838 = vpow2.f32 %v1290_v50  ;;  %v1294_v57 = vmul.f32 1.442695, %v1621_v51  ;;  %v1269_v56 = vpop.f32.mrb[24].mxu1 }
 0x924   : > { %1840 = vpow2.f32 %v1292_v52  ;;  %v1270_v59 = vadd.f32 %v1269_v56, %v1172_v38  ;;  %v1271_v53 = vpop.f32.mrb[25].mxu1 }
 0x925   : > { %1842 = vpow2.f32 %v1294_v57  ;;  %v1272_v54 = vadd.f32 %v1271_v53, %v1176_v39  ;;  %v1273_v55 = vpop.f32.mrb[26].mxu1 }
 0x926   : > { %v1622_v58 = vmul.f32 -1.702, %v1270_v59  ;;  %v1274_v60 = vpop.f32.mrb[27].mxu1 }
 0x927   : > { %v1623_v61 = vmul.f32 -1.702, %v1272_v54 }
 0x928   : > { %v1296_v62 = vmul.f32 1.442695, %v1622_v58 }
 0x929   : > { %v1298_v63 = vmul.f32 1.442695, %v1623_v61 }
 0x92a   : > { %1844 = vpow2.f32 %v1296_v62 }
 0x92b   : > { %1846 = vpow2.f32 %v1298_v63 }
 0x92c   : > { %v1837_v3 = vpop.eup %1836 }
 0x92d   : > { %v1839_v4 = vpop.eup %1838  ;;  %v1300_v5 = vadd.f32 1.0, %v1837_v3 }
 0x92e   : > { %v1841_v6 = vpop.eup %1840  ;;  %v1301_v7 = vadd.f32 1.0, %v1839_v4 }
 0x92f   : > { %v1843_v8 = vpop.eup %1842  ;;  %1848 = vrcp.f32 %v1300_v5  ;;  %v1302_v9 = vadd.f32 1.0, %v1841_v6 }
 0x930   : > { %1850 = vrcp.f32 %v1301_v7  ;;  %v1303_v10 = vadd.f32 1.0, %v1843_v8 }
 0x931   : > { %1852 = vrcp.f32 %v1302_v9 }
 0x932   : > { %1854 = vrcp.f32 %v1303_v10 }
 0x934   : > { %v1845_v11 = vpop.eup %1844 }
 0x935   : > { %v1847_v13 = vpop.eup %1846  ;;  %v1304_v14 = vadd.f32 1.0, %v1845_v11 }
 0x936   : > { %v1305_v15 = vadd.f32 1.0, %v1847_v13 }
 0x937   : > { %1856 = vrcp.f32 %v1304_v14 }
 0x938   : > { %1858 = vrcp.f32 %v1305_v15 }
 0x939   : > { %v1849_v16 = vpop.eup %1848 }
 0x93a   : > { %v1851_v17 = vpop.eup %1850  ;;  %v1318_v20 = vmul.f32 %v1849_v16, %v1260_v32 }
 0x93b   : > { %v1853_v18 = vpop.eup %1852  ;;  %v1319_v22 = vmul.f32 %v1851_v17, %v1262_v42 }
 0x93c   : > { %v1855_v19 = vpop.eup %1854  ;;  %v1320_v21 = vmul.f32 %v1853_v18, %v1264_v44 }
 0x93d   : > { %v1321_v29 = vmul.f32 %v1855_v19, %v1266_v47 }
 0x93e   : > { %v1324_v23 = vpack.c.bf16 %v1320_v21, %v1318_v20 }
 0x93f   : > { %v1325_v24 = vpack.c.bf16 %v1321_v29, %v1319_v22 }
 0x941   : > { %v1857_v26 = vpop.eup %1856  ;;  %1495 = vmatprep.mubr.bf16.mxu0 %v1325_v24 }
 0x942   : > { %v1859_v28 = vpop.eup %1858  ;;  %1496 = vmatmul.mubr.bf16.vlgmr.msra.gmra.mrb[8].mxu0 %v1324_v23  ;;  %v1322_v0 = vmul.f32 %v1857_v26, %v1270_v59 }
 0x943   : > { %v1323_v31 = vmul.f32 %v1859_v28, %v1272_v54 }
 0x944   : > { %v1326_v33 = vpack.c.bf16 %v1322_v0, %v1322_v0 }
 0x945   : > { %v1327_v1 = vpack.c.bf16 %v1323_v31, %v1323_v31 }
 0x947   : > { %1503 = vmatprep.mubr.bf16.mxu0 %v1327_v1 }
 0x94a   : > { %1504 = vmatmul.mubr.bf16.gmra.mrb[12].mxu0 %v1326_v33 }
 0xa15   : > { %v1681_v34 = vpop.f32.mrb[8].mxu0 }
 0xa16   : > { %v1682_v35 = vpop.f32.mrb[9].mxu0 }
 0xa17   : > { %v1683_v36 = vadd.f32 %v1682_v35, %v1681_v34  ;;  %v1684_v37 = vpop.f32.mrb[10].mxu0 }
 0xa18   : > { %v1685_v38 = vpop.f32.mrb[11].mxu0 }
 0xa19   : > { %v1498_v39 = vadd.f32 %v1683_v36, %v1624_v2  ;;  %v1686_v40 = vadd.f32 %v1685_v38, %v1684_v37 }
 0xa1b   : > { %v1511_v32 = vadd.f32 %v1498_v39, %v2103_v25  ;;  %v1501_v41 = vadd.f32 %v1686_v40, %v1624_v2 }
 0xa1d   : > { %1514 = vst.msk [vmem:[%s440_s23] sm:$0xff] %vm447_vm0, %v1511_v32  ;;  %v1512_v42 = vadd.f32 %v1501_v41, %v2106_v27  ;;  %v1687_v12 = vpop.f32.mrb[12].mxu0 }
 0xa1e   : > { %v1688_v43 = vpop.f32.mrb[13].mxu0 }
 0xa1f   : > { %1515 = vst.msk [vmem:[%s440_s23 + $0x8] sm:$0xff] %vm447_vm0, %v1512_v42  ;;  %v1689_v44 = vadd.f32 %v1688_v43, %v1687_v12  ;;  %v1690_v45 = vpop.f32.mrb[14].mxu0 }
 0xa20   : > { %v1691_v46 = vpop.f32.mrb[15].mxu0 }
 0xa21   : > { %v1506_v47 = vadd.f32 %v1689_v44, %v1624_v2 }
 0xa23   : > { %v1513_v48 = vadd.f32 %v1506_v47, %v2110_v30 }
 0xa25   : > { %1516 = vst.msk [vmem:[%s440_s23 + $0x10] sm:$0xff] %vm447_vm0, %v1513_v48 }
 0xa26 PF: > { %s23_s25 = sadd.s32 1, %s1866_s25  }
 0xa27   : > { %p20_p4 = scmp.ge.s32.totalorder %s23_s25, 4  }
 0xa29   :  { %22 = sbr.rel (!%p20_p4) target bundleno = 1 (0x1), region = 102 }

</bundles_post_ra>
